<compile_context>
chip_gen: v7x
topology: tpu7x:2x2x1
jax: 0.10.0
libtpu: 0.0.40
codegen_flags: <defaults>
</compile_context>

<pallas_src>
import functools

import jax
import jax.numpy as jnp
from jax import lax
from jax.experimental import pallas as pl
from jax.experimental.pallas import tpu as pltpu


def _round_up(x, m):
    return ((x + m - 1) // m) * m


def _roll(x, shift, axis):
    """Circular shift with jnp.roll semantics via the XLU rotate unit."""
    size = x.shape[axis]
    return pltpu.roll(x, shift % size, axis)


def _zs_subiter(x, step):
    """One Zhang-Suen thinning sub-iteration on an int32 {0,1} image.

    The image carries a >=1 pixel zero border, so the circular wrap of the
    rolls only ever reaches background pixels (which are never modified,
    since the deletion condition requires x > 0).
    """
    up = _roll(x, 1, 0)        # x[i-1, j]
    down = _roll(x, -1, 0)     # x[i+1, j]
    P2 = up                    # N
    P6 = down                  # S
    P4 = _roll(x, -1, 1)       # E : x[i,   j+1]
    P8 = _roll(x, 1, 1)        # W : x[i,   j-1]
    P3 = _roll(up, -1, 1)      # NE: x[i-1, j+1]
    P9 = _roll(up, 1, 1)       # NW: x[i-1, j-1]
    P5 = _roll(down, -1, 1)    # SE: x[i+1, j+1]
    P7 = _roll(down, 1, 1)     # SW: x[i+1, j-1]

    nbs = [P2, P3, P4, P5, P6, P7, P8, P9]
    B = P2 + P3 + P4 + P5 + P6 + P7 + P8 + P9                 # nonzero neighbors
    seq = nbs + [P2]
    A = sum((1 - seq[i]) * seq[i + 1] for i in range(8))       # 0->1 transitions

    b2, b4, b6, b8 = P2 > 0, P4 > 0, P6 > 0, P8 > 0
    cond = (x > 0) & (B >= 2) & (B <= 6) & (A == 1)
    if step == 0:
        cond &= jnp.logical_not(b2 & b4 & b6) & jnp.logical_not(b4 & b6 & b8)
    else:
        cond &= jnp.logical_not(b2 & b4 & b8) & jnp.logical_not(b2 & b6 & b8)
    return jnp.where(cond, 0, x)


# ---------------------------------------------------------------------------
# Fused kernel: sigmoid + threshold -> interleaved thinning -> selector + BCE sum
# ---------------------------------------------------------------------------
def _skeleton_loss_kernel(filter_p, content_h, content_w, n_iter,
                          pred_ref, target_ref, loss_ref):
    hp, wp = pred_ref.shape

    # --- stage 1: sigmoid normalization + binarization (no HBM round-trip) ---
    t = target_ref[...]
    prob = 1.0 / (1.0 + jnp.exp(-pred_ref[...]))               # EUP exp

    row = lax.broadcasted_iota(jnp.int32, (hp, wp), 0)
    col = lax.broadcasted_iota(jnp.int32, (hp, wp), 1)
    valid = (row >= 1) & (row <= content_h) & (col >= 1) & (col <= content_w)

    pred_bin = (prob > filter_p) & valid
    gt_bin = (t > 0.5) & valid

    # --- stage 2: Zhang-Suen thinning of both masks, interleaved, VMEM-resident ---
    # TODO(synk): skimage.morphology.skeletonize (LUT-based Zhang thinning, run to
    # convergence on the host) is approximated by this fixed-count in-kernel
    # Zhang-Suen loop; borderline pixels may differ from the numpy reference.
    def body(_, carry):
        g, p = carry
        g = _zs_subiter(g, 0)
        p = _zs_subiter(p, 0)
        g = _zs_subiter(g, 1)
        p = _zs_subiter(p, 1)
        return (g, p)

    gt_sk_i, pred_sk_i = lax.fori_loop(
        0, n_iter, body, (gt_bin.astype(jnp.int32), pred_bin.astype(jnp.int32)))
    gt_sk = gt_sk_i > 0
    pred_sk = pred_sk_i > 0

    # --- stage 3: selector + masked BCE(sum) reduction ---
    # xor(and(a, b), a) == a & ~b
    pos_sel = gt_sk & jnp.logical_not(pred_bin)
    neg_sel = pred_sk & jnp.logical_not(gt_bin)
    sel = pos_sel | neg_sel

    # nn.BCELoss(reduction='sum') over selected elements; PyTorch clamps logs at -100.
    log_p = jnp.maximum(jnp.log(prob), -100.0)
    log_1mp = jnp.maximum(jnp.log(1.0 - prob), -100.0)
    bce = -(t * log_p + (1.0 - t) * log_1mp)
    loss_ref[0] = jnp.sum(jnp.where(sel, bce, 0.0))


# ---------------------------------------------------------------------------
# Wrapper
# ---------------------------------------------------------------------------
def skeleton_loss(pred, target, filter_p=0.5):
    """Forward pass of SkeletonLoss(BCELoss, reduction='sum', Sigmoid), weight=None.

    pred, target: (1, 1, H, W) arrays (NCHW, batch=1, channel=1).
    Returns: (1,) float32 loss (0.0 when the selector is empty).
    """
    assert pred.ndim == 4 and pred.shape[0] == 1 and pred.shape[1] == 1
    h, w = pred.shape[2], pred.shape[3]
    pred2d = pred.reshape(h, w).astype(jnp.float32)
    target2d = target.reshape(h, w).astype(jnp.float32)        # target.type(pred.dtype)

    # Zero-padded, layout-friendly canvas: >=1 background ring (makes the circular
    # pltpu.roll wrap harmless) + sublane/lane aligned (H%8==0, W%128==0).
    hp = _round_up(h + 2, 8)
    wp = _round_up(w + 2, 128)
    pred_pad = jnp.pad(pred2d, ((1, hp - h - 1), (1, wp - w - 1)),
                       constant_values=-100.0)   # sigmoid(-100) ~ 0 -> background
    target_pad = jnp.pad(target2d, ((1, hp - h - 1), (1, wp - w - 1)),
                         constant_values=0.0)

    # One boundary layer is peeled from every side per full Zhang-Suen pass, so
    # ceil(max(H,W)/2)+1 passes reach the fixed point; extra passes are no-ops.
    # TODO(synk): a 'changed'-based early exit (lax.while_loop) would cut typical
    # trip counts further; kept fixed-count for lowering robustness.
    n_iter = max(h, w) // 2 + 1

    kernel = functools.partial(_skeleton_loss_kernel, float(filter_p), h, w, n_iter)

    # Whole-image single block; raise scoped VMEM limit for large images
    # (capped below v7x's 64 MiB physical VMEM).
    vmem_est = 24 * hp * wp * 4
    vmem_limit = int(min(60 * 2 ** 20, max(32 * 2 ** 20, vmem_est)))

    loss = pl.pallas_call(
        kernel,
        out_shape=jax.ShapeDtypeStruct((1,), jnp.float32),
        in_specs=[pl.BlockSpec(memory_space=pltpu.MemorySpace.VMEM)] * 2,
        out_specs=pl.BlockSpec(memory_space=pltpu.MemorySpace.SMEM),
        compiler_params=pltpu.CompilerParams(vmem_limit_bytes=vmem_limit),
    )(pred_pad, target_pad)
    return loss


if __name__ == "__main__":
    key = jax.random.PRNGKey(0)
    k1, k2 = jax.random.split(key)
    H = W = 16
    # pred: raw logits; target: binary ground-truth mask (NCHW, batch=1, channel=1).
    pred = jax.random.normal(k1, (1, 1, H, W), dtype=jnp.float32)
    target = (jax.random.uniform(k2, (1, 1, H, W)) > 0.5).astype(jnp.float32)

    loss = skeleton_loss(pred, target, filter_p=0.5)
    jax.block_until_ready(loss)
    print("KERNEL_OK")
</pallas_src>

<mosaic_0001>
module attributes {stable_mosaic.version = 11 : i64} {
  func.func @_skeleton_loss_kernel(%arg0: memref<24x128xf32, #tpu.memory_space<vmem>>, %arg1: memref<24x128xf32, #tpu.memory_space<vmem>>, %arg2: memref<1xf32, #tpu.memory_space<smem>>) attributes {dimension_semantics = [], scalar_prefetch = 0 : i64, scratch_operands = 0 : i64, tpu.core_type = #tpu.core_type<tc>} {
    %c0 = arith.constant 0 : index
    %c0_0 = arith.constant 0 : index
    %0 = vector.load %arg1[%c0, %c0_0] : memref<24x128xf32, #tpu.memory_space<vmem>>, vector<24x128xf32>
    %c0_1 = arith.constant 0 : index
    %c0_2 = arith.constant 0 : index
    %1 = vector.load %arg0[%c0_1, %c0_2] : memref<24x128xf32, #tpu.memory_space<vmem>>, vector<24x128xf32>
    %cst = arith.constant 0.000000e+00 : f32
    %2 = vector.broadcast %cst : f32 to vector<24x128xf32>
    %3 = arith.subf %2, %1 : vector<24x128xf32>
    %4 = math.exp %3 : vector<24x128xf32>
    %cst_3 = arith.constant 1.000000e+00 : f32
    %5 = vector.broadcast %cst_3 : f32 to vector<24x128xf32>
    %6 = arith.addf %5, %4 : vector<24x128xf32>
    %cst_4 = arith.constant 1.000000e+00 : f32
    %7 = vector.broadcast %cst_4 : f32 to vector<24x128xf32>
    %8 = arith.divf %7, %6 : vector<24x128xf32>
    %9 = tpu.iota {dimensions = array<i32: 0>} : vector<24x128xi32>
    %10 = tpu.iota {dimensions = array<i32: 1>} : vector<24x128xi32>
    %c1_i32 = arith.constant 1 : i32
    %11 = vector.broadcast %c1_i32 : i32 to vector<24x128xi32>
    %12 = arith.cmpi sge, %9, %11 : vector<24x128xi32>
    %c16_i32 = arith.constant 16 : i32
    %13 = vector.broadcast %c16_i32 : i32 to vector<24x128xi32>
    %14 = arith.cmpi sle, %9, %13 : vector<24x128xi32>
    %15 = arith.andi %12, %14 : vector<24x128xi1>
    %c1_i32_5 = arith.constant 1 : i32
    %16 = vector.broadcast %c1_i32_5 : i32 to vector<24x128xi32>
    %17 = arith.cmpi sge, %10, %16 : vector<24x128xi32>
    %18 = arith.andi %15, %17 : vector<24x128xi1>
    %c16_i32_6 = arith.constant 16 : i32
    %19 = vector.broadcast %c16_i32_6 : i32 to vector<24x128xi32>
    %20 = arith.cmpi sle, %10, %19 : vector<24x128xi32>
    %21 = arith.andi %18, %20 : vector<24x128xi1>
    %cst_7 = arith.constant 5.000000e-01 : f32
    %22 = vector.broadcast %cst_7 : f32 to vector<24x128xf32>
    %23 = arith.cmpf ogt, %8, %22 : vector<24x128xf32>
    %24 = arith.andi %23, %21 : vector<24x128xi1>
    %cst_8 = arith.constant 5.000000e-01 : f32
    %25 = vector.broadcast %cst_8 : f32 to vector<24x128xf32>
    %26 = arith.cmpf ogt, %0, %25 : vector<24x128xf32>
    %27 = arith.andi %26, %21 : vector<24x128xi1>
    %28 = arith.extui %27 : vector<24x128xi1> to vector<24x128xi32>
    %29 = arith.extui %24 : vector<24x128xi1> to vector<24x128xi32>
    %c0_i32 = arith.constant 0 : i32
    %c9_i32 = arith.constant 9 : i32
    %30 = arith.addi %c0_i32, %c9_i32 : i32
    %c1_i32_9 = arith.constant 1 : i32
    %31:2 = scf.for %arg3 = %c0_i32 to %30 step %c1_i32_9 iter_args(%arg4 = %28, %arg5 = %29) -> (vector<24x128xi32>, vector<24x128xi32>)  : i32 {
      %c1_i32_22 = arith.constant 1 : i32
      %63 = tpu.dynamic_rotate %arg4 by %c1_i32_22 dim 0 : vector<24x128xi32>, i32 -> vector<24x128xi32>
      %c23_i32 = arith.constant 23 : i32
      %64 = tpu.dynamic_rotate %arg4 by %c23_i32 dim 0 : vector<24x128xi32>, i32 -> vector<24x128xi32>
      %c127_i32 = arith.constant 127 : i32
      %65 = tpu.dynamic_rotate %arg4 by %c127_i32 dim 1 : vector<24x128xi32>, i32 -> vector<24x128xi32>
      %c1_i32_23 = arith.constant 1 : i32
      %66 = tpu.dynamic_rotate %arg4 by %c1_i32_23 dim 1 : vector<24x128xi32>, i32 -> vector<24x128xi32>
      %c127_i32_24 = arith.constant 127 : i32
      %67 = tpu.dynamic_rotate %63 by %c127_i32_24 dim 1 : vector<24x128xi32>, i32 -> vector<24x128xi32>
      %c1_i32_25 = arith.constant 1 : i32
      %68 = tpu.dynamic_rotate %63 by %c1_i32_25 dim 1 : vector<24x128xi32>, i32 -> vector<24x128xi32>
      %c127_i32_26 = arith.constant 127 : i32
      %69 = tpu.dynamic_rotate %64 by %c127_i32_26 dim 1 : vector<24x128xi32>, i32 -> vector<24x128xi32>
      %c1_i32_27 = arith.constant 1 : i32
      %70 = tpu.dynamic_rotate %64 by %c1_i32_27 dim 1 : vector<24x128xi32>, i32 -> vector<24x128xi32>
      %71 = arith.addi %63, %67 : vector<24x128xi32>
      %72 = arith.addi %71, %65 : vector<24x128xi32>
      %73 = arith.addi %72, %69 : vector<24x128xi32>
      %74 = arith.addi %73, %64 : vector<24x128xi32>
      %75 = arith.addi %74, %70 : vector<24x128xi32>
      %76 = arith.addi %75, %66 : vector<24x128xi32>
      %77 = arith.addi %76, %68 : vector<24x128xi32>
      %c1_i32_28 = arith.constant 1 : i32
      %78 = vector.broadcast %c1_i32_28 : i32 to vector<24x128xi32>
      %79 = arith.subi %78, %63 : vector<24x128xi32>
      %80 = arith.muli %79, %67 : vector<24x128xi32>
      %c0_i32_29 = arith.constant 0 : i32
      %81 = vector.broadcast %c0_i32_29 : i32 to vector<24x128xi32>
      %82 = arith.addi %81, %80 : vector<24x128xi32>
      %c1_i32_30 = arith.constant 1 : i32
      %83 = vector.broadcast %c1_i32_30 : i32 to vector<24x128xi32>
      %84 = arith.subi %83, %67 : vector<24x128xi32>
      %85 = arith.muli %84, %65 : vector<24x128xi32>
      %86 = arith.addi %82, %85 : vector<24x128xi32>
      %c1_i32_31 = arith.constant 1 : i32
      %87 = vector.broadcast %c1_i32_31 : i32 to vector<24x128xi32>
      %88 = arith.subi %87, %65 : vector<24x128xi32>
      %89 = arith.muli %88, %69 : vector<24x128xi32>
      %90 = arith.addi %86, %89 : vector<24x128xi32>
      %c1_i32_32 = arith.constant 1 : i32
      %91 = vector.broadcast %c1_i32_32 : i32 to vector<24x128xi32>
      %92 = arith.subi %91, %69 : vector<24x128xi32>
      %93 = arith.muli %92, %64 : vector<24x128xi32>
      %94 = arith.addi %90, %93 : vector<24x128xi32>
      %c1_i32_33 = arith.constant 1 : i32
      %95 = vector.broadcast %c1_i32_33 : i32 to vector<24x128xi32>
      %96 = arith.subi %95, %64 : vector<24x128xi32>
      %97 = arith.muli %96, %70 : vector<24x128xi32>
      %98 = arith.addi %94, %97 : vector<24x128xi32>
      %c1_i32_34 = arith.constant 1 : i32
      %99 = vector.broadcast %c1_i32_34 : i32 to vector<24x128xi32>
      %100 = arith.subi %99, %70 : vector<24x128xi32>
      %101 = arith.muli %100, %66 : vector<24x128xi32>
      %102 = arith.addi %98, %101 : vector<24x128xi32>
      %c1_i32_35 = arith.constant 1 : i32
      %103 = vector.broadcast %c1_i32_35 : i32 to vector<24x128xi32>
      %104 = arith.subi %103, %66 : vector<24x128xi32>
      %105 = arith.muli %104, %68 : vector<24x128xi32>
      %106 = arith.addi %102, %105 : vector<24x128xi32>
      %c1_i32_36 = arith.constant 1 : i32
      %107 = vector.broadcast %c1_i32_36 : i32 to vector<24x128xi32>
      %108 = arith.subi %107, %68 : vector<24x128xi32>
      %109 = arith.muli %108, %63 : vector<24x128xi32>
      %110 = arith.addi %106, %109 : vector<24x128xi32>
      %c0_i32_37 = arith.constant 0 : i32
      %111 = vector.broadcast %c0_i32_37 : i32 to vector<24x128xi32>
      %112 = arith.cmpi sgt, %63, %111 : vector<24x128xi32>
      %c0_i32_38 = arith.constant 0 : i32
      %113 = vector.broadcast %c0_i32_38 : i32 to vector<24x128xi32>
      %114 = arith.cmpi sgt, %65, %113 : vector<24x128xi32>
      %c0_i32_39 = arith.constant 0 : i32
      %115 = vector.broadcast %c0_i32_39 : i32 to vector<24x128xi32>
      %116 = arith.cmpi sgt, %64, %115 : vector<24x128xi32>
      %c0_i32_40 = arith.constant 0 : i32
      %117 = vector.broadcast %c0_i32_40 : i32 to vector<24x128xi32>
      %118 = arith.cmpi sgt, %66, %117 : vector<24x128xi32>
      %c0_i32_41 = arith.constant 0 : i32
      %119 = vector.broadcast %c0_i32_41 : i32 to vector<24x128xi32>
      %120 = arith.cmpi sgt, %arg4, %119 : vector<24x128xi32>
      %c2_i32 = arith.constant 2 : i32
      %121 = vector.broadcast %c2_i32 : i32 to vector<24x128xi32>
      %122 = arith.cmpi sge, %77, %121 : vector<24x128xi32>
      %123 = arith.andi %120, %122 : vector<24x128xi1>
      %c6_i32 = arith.constant 6 : i32
      %124 = vector.broadcast %c6_i32 : i32 to vector<24x128xi32>
      %125 = arith.cmpi sle, %77, %124 : vector<24x128xi32>
      %126 = arith.andi %123, %125 : vector<24x128xi1>
      %c1_i32_42 = arith.constant 1 : i32
      %127 = vector.broadcast %c1_i32_42 : i32 to vector<24x128xi32>
      %128 = arith.cmpi eq, %110, %127 : vector<24x128xi32>
      %129 = arith.andi %126, %128 : vector<24x128xi1>
      %130 = arith.andi %112, %114 : vector<24x128xi1>
      %131 = arith.andi %130, %116 : vector<24x128xi1>
      %cst_43 = arith.constant dense<true> : vector<24x128xi1>
      %132 = arith.xori %131, %cst_43 : vector<24x128xi1>
      %133 = arith.andi %114, %116 : vector<24x128xi1>
      %134 = arith.andi %133, %118 : vector<24x128xi1>
      %cst_44 = arith.constant dense<true> : vector<24x128xi1>
      %135 = arith.xori %134, %cst_44 : vector<24x128xi1>
      %136 = arith.andi %132, %135 : vector<24x128xi1>
      %137 = arith.andi %129, %136 : vector<24x128xi1>
      %c0_i32_45 = arith.constant 0 : i32
      %138 = vector.broadcast %c0_i32_45 : i32 to vector<24x128xi32>
      %139 = arith.select %137, %138, %arg4 : vector<24x128xi1>, vector<24x128xi32>
      %c1_i32_46 = arith.constant 1 : i32
      %140 = tpu.dynamic_rotate %arg5 by %c1_i32_46 dim 0 : vector<24x128xi32>, i32 -> vector<24x128xi32>
      %c23_i32_47 = arith.constant 23 : i32
      %141 = tpu.dynamic_rotate %arg5 by %c23_i32_47 dim 0 : vector<24x128xi32>, i32 -> vector<24x128xi32>
      %c127_i32_48 = arith.constant 127 : i32
      %142 = tpu.dynamic_rotate %arg5 by %c127_i32_48 dim 1 : vector<24x128xi32>, i32 -> vector<24x128xi32>
      %c1_i32_49 = arith.constant 1 : i32
      %143 = tpu.dynamic_rotate %arg5 by %c1_i32_49 dim 1 : vector<24x128xi32>, i32 -> vector<24x128xi32>
      %c127_i32_50 = arith.constant 127 : i32
      %144 = tpu.dynamic_rotate %140 by %c127_i32_50 dim 1 : vector<24x128xi32>, i32 -> vector<24x128xi32>
      %c1_i32_51 = arith.constant 1 : i32
      %145 = tpu.dynamic_rotate %140 by %c1_i32_51 dim 1 : vector<24x128xi32>, i32 -> vector<24x128xi32>
      %c127_i32_52 = arith.constant 127 : i32
      %146 = tpu.dynamic_rotate %141 by %c127_i32_52 dim 1 : vector<24x128xi32>, i32 -> vector<24x128xi32>
      %c1_i32_53 = arith.constant 1 : i32
      %147 = tpu.dynamic_rotate %141 by %c1_i32_53 dim 1 : vector<24x128xi32>, i32 -> vector<24x128xi32>
      %148 = arith.addi %140, %144 : vector<24x128xi32>
      %149 = arith.addi %148, %142 : vector<24x128xi32>
      %150 = arith.addi %149, %146 : vector<24x128xi32>
      %151 = arith.addi %150, %141 : vector<24x128xi32>
      %152 = arith.addi %151, %147 : vector<24x128xi32>
      %153 = arith.addi %152, %143 : vector<24x128xi32>
      %154 = arith.addi %153, %145 : vector<24x128xi32>
      %c1_i32_54 = arith.constant 1 : i32
      %155 = vector.broadcast %c1_i32_54 : i32 to vector<24x128xi32>
      %156 = arith.subi %155, %140 : vector<24x128xi32>
      %157 = arith.muli %156, %144 : vector<24x128xi32>
      %c0_i32_55 = arith.constant 0 : i32
      %158 = vector.broadcast %c0_i32_55 : i32 to vector<24x128xi32>
      %159 = arith.addi %158, %157 : vector<24x128xi32>
      %c1_i32_56 = arith.constant 1 : i32
      %160 = vector.broadcast %c1_i32_56 : i32 to vector<24x128xi32>
      %161 = arith.subi %160, %144 : vector<24x128xi32>
      %162 = arith.muli %161, %142 : vector<24x128xi32>
      %163 = arith.addi %159, %162 : vector<24x128xi32>
      %c1_i32_57 = arith.constant 1 : i32
      %164 = vector.broadcast %c1_i32_57 : i32 to vector<24x128xi32>
      %165 = arith.subi %164, %142 : vector<24x128xi32>
      %166 = arith.muli %165, %146 : vector<24x128xi32>
      %167 = arith.addi %163, %166 : vector<24x128xi32>
      %c1_i32_58 = arith.constant 1 : i32
      %168 = vector.broadcast %c1_i32_58 : i32 to vector<24x128xi32>
      %169 = arith.subi %168, %146 : vector<24x128xi32>
      %170 = arith.muli %169, %141 : vector<24x128xi32>
      %171 = arith.addi %167, %170 : vector<24x128xi32>
      %c1_i32_59 = arith.constant 1 : i32
      %172 = vector.broadcast %c1_i32_59 : i32 to vector<24x128xi32>
      %173 = arith.subi %172, %141 : vector<24x128xi32>
      %174 = arith.muli %173, %147 : vector<24x128xi32>
      %175 = arith.addi %171, %174 : vector<24x128xi32>
      %c1_i32_60 = arith.constant 1 : i32
      %176 = vector.broadcast %c1_i32_60 : i32 to vector<24x128xi32>
      %177 = arith.subi %176, %147 : vector<24x128xi32>
      %178 = arith.muli %177, %143 : vector<24x128xi32>
      %179 = arith.addi %175, %178 : vector<24x128xi32>
      %c1_i32_61 = arith.constant 1 : i32
      %180 = vector.broadcast %c1_i32_61 : i32 to vector<24x128xi32>
      %181 = arith.subi %180, %143 : vector<24x128xi32>
      %182 = arith.muli %181, %145 : vector<24x128xi32>
      %183 = arith.addi %179, %182 : vector<24x128xi32>
      %c1_i32_62 = arith.constant 1 : i32
      %184 = vector.broadcast %c1_i32_62 : i32 to vector<24x128xi32>
      %185 = arith.subi %184, %145 : vector<24x128xi32>
      %186 = arith.muli %185, %140 : vector<24x128xi32>
      %187 = arith.addi %183, %186 : vector<24x128xi32>
      %c0_i32_63 = arith.constant 0 : i32
      %188 = vector.broadcast %c0_i32_63 : i32 to vector<24x128xi32>
      %189 = arith.cmpi sgt, %140, %188 : vector<24x128xi32>
      %c0_i32_64 = arith.constant 0 : i32
      %190 = vector.broadcast %c0_i32_64 : i32 to vector<24x128xi32>
      %191 = arith.cmpi sgt, %142, %190 : vector<24x128xi32>
      %c0_i32_65 = arith.constant 0 : i32
      %192 = vector.broadcast %c0_i32_65 : i32 to vector<24x128xi32>
      %193 = arith.cmpi sgt, %141, %192 : vector<24x128xi32>
      %c0_i32_66 = arith.constant 0 : i32
      %194 = vector.broadcast %c0_i32_66 : i32 to vector<24x128xi32>
      %195 = arith.cmpi sgt, %143, %194 : vector<24x128xi32>
      %c0_i32_67 = arith.constant 0 : i32
      %196 = vector.broadcast %c0_i32_67 : i32 to vector<24x128xi32>
      %197 = arith.cmpi sgt, %arg5, %196 : vector<24x128xi32>
      %c2_i32_68 = arith.constant 2 : i32
      %198 = vector.broadcast %c2_i32_68 : i32 to vector<24x128xi32>
      %199 = arith.cmpi sge, %154, %198 : vector<24x128xi32>
      %200 = arith.andi %197, %199 : vector<24x128xi1>
      %c6_i32_69 = arith.constant 6 : i32
      %201 = vector.broadcast %c6_i32_69 : i32 to vector<24x128xi32>
      %202 = arith.cmpi sle, %154, %201 : vector<24x128xi32>
      %203 = arith.andi %200, %202 : vector<24x128xi1>
      %c1_i32_70 = arith.constant 1 : i32
      %204 = vector.broadcast %c1_i32_70 : i32 to vector<24x128xi32>
      %205 = arith.cmpi eq, %187, %204 : vector<24x128xi32>
      %206 = arith.andi %203, %205 : vector<24x128xi1>
      %207 = arith.andi %189, %191 : vector<24x128xi1>
      %208 = arith.andi %207, %193 : vector<24x128xi1>
      %cst_71 = arith.constant dense<true> : vector<24x128xi1>
      %209 = arith.xori %208, %cst_71 : vector<24x128xi1>
      %210 = arith.andi %191, %193 : vector<24x128xi1>
      %211 = arith.andi %210, %195 : vector<24x128xi1>
      %cst_72 = arith.constant dense<true> : vector<24x128xi1>
      %212 = arith.xori %211, %cst_72 : vector<24x128xi1>
      %213 = arith.andi %209, %212 : vector<24x128xi1>
      %214 = arith.andi %206, %213 : vector<24x128xi1>
      %c0_i32_73 = arith.constant 0 : i32
      %215 = vector.broadcast %c0_i32_73 : i32 to vector<24x128xi32>
      %216 = arith.select %214, %215, %arg5 : vector<24x128xi1>, vector<24x128xi32>
      %c1_i32_74 = arith.constant 1 : i32
      %217 = tpu.dynamic_rotate %139 by %c1_i32_74 dim 0 : vector<24x128xi32>, i32 -> vector<24x128xi32>
      %c23_i32_75 = arith.constant 23 : i32
      %218 = tpu.dynamic_rotate %139 by %c23_i32_75 dim 0 : vector<24x128xi32>, i32 -> vector<24x128xi32>
      %c127_i32_76 = arith.constant 127 : i32
      %219 = tpu.dynamic_rotate %139 by %c127_i32_76 dim 1 : vector<24x128xi32>, i32 -> vector<24x128xi32>
      %c1_i32_77 = arith.constant 1 : i32
      %220 = tpu.dynamic_rotate %139 by %c1_i32_77 dim 1 : vector<24x128xi32>, i32 -> vector<24x128xi32>
      %c127_i32_78 = arith.constant 127 : i32
      %221 = tpu.dynamic_rotate %217 by %c127_i32_78 dim 1 : vector<24x128xi32>, i32 -> vector<24x128xi32>
      %c1_i32_79 = arith.constant 1 : i32
      %222 = tpu.dynamic_rotate %217 by %c1_i32_79 dim 1 : vector<24x128xi32>, i32 -> vector<24x128xi32>
      %c127_i32_80 = arith.constant 127 : i32
      %223 = tpu.dynamic_rotate %218 by %c127_i32_80 dim 1 : vector<24x128xi32>, i32 -> vector<24x128xi32>
      %c1_i32_81 = arith.constant 1 : i32
      %224 = tpu.dynamic_rotate %218 by %c1_i32_81 dim 1 : vector<24x128xi32>, i32 -> vector<24x128xi32>
      %225 = arith.addi %217, %221 : vector<24x128xi32>
      %226 = arith.addi %225, %219 : vector<24x128xi32>
      %227 = arith.addi %226, %223 : vector<24x128xi32>
      %228 = arith.addi %227, %218 : vector<24x128xi32>
      %229 = arith.addi %228, %224 : vector<24x128xi32>
      %230 = arith.addi %229, %220 : vector<24x128xi32>
      %231 = arith.addi %230, %222 : vector<24x128xi32>
      %c1_i32_82 = arith.constant 1 : i32
      %232 = vector.broadcast %c1_i32_82 : i32 to vector<24x128xi32>
      %233 = arith.subi %232, %217 : vector<24x128xi32>
      %234 = arith.muli %233, %221 : vector<24x128xi32>
      %c0_i32_83 = arith.constant 0 : i32
      %235 = vector.broadcast %c0_i32_83 : i32 to vector<24x128xi32>
      %236 = arith.addi %235, %234 : vector<24x128xi32>
      %c1_i32_84 = arith.constant 1 : i32
      %237 = vector.broadcast %c1_i32_84 : i32 to vector<24x128xi32>
      %238 = arith.subi %237, %221 : vector<24x128xi32>
      %239 = arith.muli %238, %219 : vector<24x128xi32>
      %240 = arith.addi %236, %239 : vector<24x128xi32>
      %c1_i32_85 = arith.constant 1 : i32
      %241 = vector.broadcast %c1_i32_85 : i32 to vector<24x128xi32>
      %242 = arith.subi %241, %219 : vector<24x128xi32>
      %243 = arith.muli %242, %223 : vector<24x128xi32>
      %244 = arith.addi %240, %243 : vector<24x128xi32>
      %c1_i32_86 = arith.constant 1 : i32
      %245 = vector.broadcast %c1_i32_86 : i32 to vector<24x128xi32>
      %246 = arith.subi %245, %223 : vector<24x128xi32>
      %247 = arith.muli %246, %218 : vector<24x128xi32>
      %248 = arith.addi %244, %247 : vector<24x128xi32>
      %c1_i32_87 = arith.constant 1 : i32
      %249 = vector.broadcast %c1_i32_87 : i32 to vector<24x128xi32>
      %250 = arith.subi %249, %218 : vector<24x128xi32>
      %251 = arith.muli %250, %224 : vector<24x128xi32>
      %252 = arith.addi %248, %251 : vector<24x128xi32>
      %c1_i32_88 = arith.constant 1 : i32
      %253 = vector.broadcast %c1_i32_88 : i32 to vector<24x128xi32>
      %254 = arith.subi %253, %224 : vector<24x128xi32>
      %255 = arith.muli %254, %220 : vector<24x128xi32>
      %256 = arith.addi %252, %255 : vector<24x128xi32>
      %c1_i32_89 = arith.constant 1 : i32
      %257 = vector.broadcast %c1_i32_89 : i32 to vector<24x128xi32>
      %258 = arith.subi %257, %220 : vector<24x128xi32>
      %259 = arith.muli %258, %222 : vector<24x128xi32>
      %260 = arith.addi %256, %259 : vector<24x128xi32>
      %c1_i32_90 = arith.constant 1 : i32
      %261 = vector.broadcast %c1_i32_90 : i32 to vector<24x128xi32>
      %262 = arith.subi %261, %222 : vector<24x128xi32>
      %263 = arith.muli %262, %217 : vector<24x128xi32>
      %264 = arith.addi %260, %263 : vector<24x128xi32>
      %c0_i32_91 = arith.constant 0 : i32
      %265 = vector.broadcast %c0_i32_91 : i32 to vector<24x128xi32>
      %266 = arith.cmpi sgt, %217, %265 : vector<24x128xi32>
      %c0_i32_92 = arith.constant 0 : i32
      %267 = vector.broadcast %c0_i32_92 : i32 to vector<24x128xi32>
      %268 = arith.cmpi sgt, %219, %267 : vector<24x128xi32>
      %c0_i32_93 = arith.constant 0 : i32
      %269 = vector.broadcast %c0_i32_93 : i32 to vector<24x128xi32>
      %270 = arith.cmpi sgt, %218, %269 : vector<24x128xi32>
      %c0_i32_94 = arith.constant 0 : i32
      %271 = vector.broadcast %c0_i32_94 : i32 to vector<24x128xi32>
      %272 = arith.cmpi sgt, %220, %271 : vector<24x128xi32>
      %c0_i32_95 = arith.constant 0 : i32
      %273 = vector.broadcast %c0_i32_95 : i32 to vector<24x128xi32>
      %274 = arith.cmpi sgt, %139, %273 : vector<24x128xi32>
      %c2_i32_96 = arith.constant 2 : i32
      %275 = vector.broadcast %c2_i32_96 : i32 to vector<24x128xi32>
      %276 = arith.cmpi sge, %231, %275 : vector<24x128xi32>
      %277 = arith.andi %274, %276 : vector<24x128xi1>
      %c6_i32_97 = arith.constant 6 : i32
      %278 = vector.broadcast %c6_i32_97 : i32 to vector<24x128xi32>
      %279 = arith.cmpi sle, %231, %278 : vector<24x128xi32>
      %280 = arith.andi %277, %279 : vector<24x128xi1>
      %c1_i32_98 = arith.constant 1 : i32
      %281 = vector.broadcast %c1_i32_98 : i32 to vector<24x128xi32>
      %282 = arith.cmpi eq, %264, %281 : vector<24x128xi32>
      %283 = arith.andi %280, %282 : vector<24x128xi1>
      %284 = arith.andi %266, %268 : vector<24x128xi1>
      %285 = arith.andi %284, %272 : vector<24x128xi1>
      %cst_99 = arith.constant dense<true> : vector<24x128xi1>
      %286 = arith.xori %285, %cst_99 : vector<24x128xi1>
      %287 = arith.andi %266, %270 : vector<24x128xi1>
      %288 = arith.andi %287, %272 : vector<24x128xi1>
      %cst_100 = arith.constant dense<true> : vector<24x128xi1>
      %289 = arith.xori %288, %cst_100 : vector<24x128xi1>
      %290 = arith.andi %286, %289 : vector<24x128xi1>
      %291 = arith.andi %283, %290 : vector<24x128xi1>
      %c0_i32_101 = arith.constant 0 : i32
      %292 = vector.broadcast %c0_i32_101 : i32 to vector<24x128xi32>
      %293 = arith.select %291, %292, %139 : vector<24x128xi1>, vector<24x128xi32>
      %c1_i32_102 = arith.constant 1 : i32
      %294 = tpu.dynamic_rotate %216 by %c1_i32_102 dim 0 : vector<24x128xi32>, i32 -> vector<24x128xi32>
      %c23_i32_103 = arith.constant 23 : i32
      %295 = tpu.dynamic_rotate %216 by %c23_i32_103 dim 0 : vector<24x128xi32>, i32 -> vector<24x128xi32>
      %c127_i32_104 = arith.constant 127 : i32
      %296 = tpu.dynamic_rotate %216 by %c127_i32_104 dim 1 : vector<24x128xi32>, i32 -> vector<24x128xi32>
      %c1_i32_105 = arith.constant 1 : i32
      %297 = tpu.dynamic_rotate %216 by %c1_i32_105 dim 1 : vector<24x128xi32>, i32 -> vector<24x128xi32>
      %c127_i32_106 = arith.constant 127 : i32
      %298 = tpu.dynamic_rotate %294 by %c127_i32_106 dim 1 : vector<24x128xi32>, i32 -> vector<24x128xi32>
      %c1_i32_107 = arith.constant 1 : i32
      %299 = tpu.dynamic_rotate %294 by %c1_i32_107 dim 1 : vector<24x128xi32>, i32 -> vector<24x128xi32>
      %c127_i32_108 = arith.constant 127 : i32
      %300 = tpu.dynamic_rotate %295 by %c127_i32_108 dim 1 : vector<24x128xi32>, i32 -> vector<24x128xi32>
      %c1_i32_109 = arith.constant 1 : i32
      %301 = tpu.dynamic_rotate %295 by %c1_i32_109 dim 1 : vector<24x128xi32>, i32 -> vector<24x128xi32>
      %302 = arith.addi %294, %298 : vector<24x128xi32>
      %303 = arith.addi %302, %296 : vector<24x128xi32>
      %304 = arith.addi %303, %300 : vector<24x128xi32>
      %305 = arith.addi %304, %295 : vector<24x128xi32>
      %306 = arith.addi %305, %301 : vector<24x128xi32>
      %307 = arith.addi %306, %297 : vector<24x128xi32>
      %308 = arith.addi %307, %299 : vector<24x128xi32>
      %c1_i32_110 = arith.constant 1 : i32
      %309 = vector.broadcast %c1_i32_110 : i32 to vector<24x128xi32>
      %310 = arith.subi %309, %294 : vector<24x128xi32>
      %311 = arith.muli %310, %298 : vector<24x128xi32>
      %c0_i32_111 = arith.constant 0 : i32
      %312 = vector.broadcast %c0_i32_111 : i32 to vector<24x128xi32>
      %313 = arith.addi %312, %311 : vector<24x128xi32>
      %c1_i32_112 = arith.constant 1 : i32
      %314 = vector.broadcast %c1_i32_112 : i32 to vector<24x128xi32>
      %315 = arith.subi %314, %298 : vector<24x128xi32>
      %316 = arith.muli %315, %296 : vector<24x128xi32>
      %317 = arith.addi %313, %316 : vector<24x128xi32>
      %c1_i32_113 = arith.constant 1 : i32
      %318 = vector.broadcast %c1_i32_113 : i32 to vector<24x128xi32>
      %319 = arith.subi %318, %296 : vector<24x128xi32>
      %320 = arith.muli %319, %300 : vector<24x128xi32>
      %321 = arith.addi %317, %320 : vector<24x128xi32>
      %c1_i32_114 = arith.constant 1 : i32
      %322 = vector.broadcast %c1_i32_114 : i32 to vector<24x128xi32>
      %323 = arith.subi %322, %300 : vector<24x128xi32>
      %324 = arith.muli %323, %295 : vector<24x128xi32>
      %325 = arith.addi %321, %324 : vector<24x128xi32>
      %c1_i32_115 = arith.constant 1 : i32
      %326 = vector.broadcast %c1_i32_115 : i32 to vector<24x128xi32>
      %327 = arith.subi %326, %295 : vector<24x128xi32>
      %328 = arith.muli %327, %301 : vector<24x128xi32>
      %329 = arith.addi %325, %328 : vector<24x128xi32>
      %c1_i32_116 = arith.constant 1 : i32
      %330 = vector.broadcast %c1_i32_116 : i32 to vector<24x128xi32>
      %331 = arith.subi %330, %301 : vector<24x128xi32>
      %332 = arith.muli %331, %297 : vector<24x128xi32>
      %333 = arith.addi %329, %332 : vector<24x128xi32>
      %c1_i32_117 = arith.constant 1 : i32
      %334 = vector.broadcast %c1_i32_117 : i32 to vector<24x128xi32>
      %335 = arith.subi %334, %297 : vector<24x128xi32>
      %336 = arith.muli %335, %299 : vector<24x128xi32>
      %337 = arith.addi %333, %336 : vector<24x128xi32>
      %c1_i32_118 = arith.constant 1 : i32
      %338 = vector.broadcast %c1_i32_118 : i32 to vector<24x128xi32>
      %339 = arith.subi %338, %299 : vector<24x128xi32>
      %340 = arith.muli %339, %294 : vector<24x128xi32>
      %341 = arith.addi %337, %340 : vector<24x128xi32>
      %c0_i32_119 = arith.constant 0 : i32
      %342 = vector.broadcast %c0_i32_119 : i32 to vector<24x128xi32>
      %343 = arith.cmpi sgt, %294, %342 : vector<24x128xi32>
      %c0_i32_120 = arith.constant 0 : i32
      %344 = vector.broadcast %c0_i32_120 : i32 to vector<24x128xi32>
      %345 = arith.cmpi sgt, %296, %344 : vector<24x128xi32>
      %c0_i32_121 = arith.constant 0 : i32
      %346 = vector.broadcast %c0_i32_121 : i32 to vector<24x128xi32>
      %347 = arith.cmpi sgt, %295, %346 : vector<24x128xi32>
      %c0_i32_122 = arith.constant 0 : i32
      %348 = vector.broadcast %c0_i32_122 : i32 to vector<24x128xi32>
      %349 = arith.cmpi sgt, %297, %348 : vector<24x128xi32>
      %c0_i32_123 = arith.constant 0 : i32
      %350 = vector.broadcast %c0_i32_123 : i32 to vector<24x128xi32>
      %351 = arith.cmpi sgt, %216, %350 : vector<24x128xi32>
      %c2_i32_124 = arith.constant 2 : i32
      %352 = vector.broadcast %c2_i32_124 : i32 to vector<24x128xi32>
      %353 = arith.cmpi sge, %308, %352 : vector<24x128xi32>
      %354 = arith.andi %351, %353 : vector<24x128xi1>
      %c6_i32_125 = arith.constant 6 : i32
      %355 = vector.broadcast %c6_i32_125 : i32 to vector<24x128xi32>
      %356 = arith.cmpi sle, %308, %355 : vector<24x128xi32>
      %357 = arith.andi %354, %356 : vector<24x128xi1>
      %c1_i32_126 = arith.constant 1 : i32
      %358 = vector.broadcast %c1_i32_126 : i32 to vector<24x128xi32>
      %359 = arith.cmpi eq, %341, %358 : vector<24x128xi32>
      %360 = arith.andi %357, %359 : vector<24x128xi1>
      %361 = arith.andi %343, %345 : vector<24x128xi1>
      %362 = arith.andi %361, %349 : vector<24x128xi1>
      %cst_127 = arith.constant dense<true> : vector<24x128xi1>
      %363 = arith.xori %362, %cst_127 : vector<24x128xi1>
      %364 = arith.andi %343, %347 : vector<24x128xi1>
      %365 = arith.andi %364, %349 : vector<24x128xi1>
      %cst_128 = arith.constant dense<true> : vector<24x128xi1>
      %366 = arith.xori %365, %cst_128 : vector<24x128xi1>
      %367 = arith.andi %363, %366 : vector<24x128xi1>
      %368 = arith.andi %360, %367 : vector<24x128xi1>
      %c0_i32_129 = arith.constant 0 : i32
      %369 = vector.broadcast %c0_i32_129 : i32 to vector<24x128xi32>
      %370 = arith.select %368, %369, %216 : vector<24x128xi1>, vector<24x128xi32>
      scf.yield %293, %370 : vector<24x128xi32>, vector<24x128xi32>
    }
    %c0_i32_10 = arith.constant 0 : i32
    %32 = vector.broadcast %c0_i32_10 : i32 to vector<24x128xi32>
    %33 = arith.cmpi sgt, %31#0, %32 : vector<24x128xi32>
    %c0_i32_11 = arith.constant 0 : i32
    %34 = vector.broadcast %c0_i32_11 : i32 to vector<24x128xi32>
    %35 = arith.cmpi sgt, %31#1, %34 : vector<24x128xi32>
    %cst_12 = arith.constant dense<true> : vector<24x128xi1>
    %36 = arith.xori %24, %cst_12 : vector<24x128xi1>
    %37 = arith.andi %33, %36 : vector<24x128xi1>
    %cst_13 = arith.constant dense<true> : vector<24x128xi1>
    %38 = arith.xori %27, %cst_13 : vector<24x128xi1>
    %39 = arith.andi %35, %38 : vector<24x128xi1>
    %40 = arith.ori %37, %39 : vector<24x128xi1>
    %41 = math.log %8 : vector<24x128xf32>
    %cst_14 = arith.constant -1.000000e+02 : f32
    %42 = vector.broadcast %cst_14 : f32 to vector<24x128xf32>
    %43 = arith.maximumf %41, %42 : vector<24x128xf32>
    %cst_15 = arith.constant 1.000000e+00 : f32
    %44 = vector.broadcast %cst_15 : f32 to vector<24x128xf32>
    %45 = arith.subf %44, %8 : vector<24x128xf32>
    %46 = math.log %45 : vector<24x128xf32>
    %cst_16 = arith.constant -1.000000e+02 : f32
    %47 = vector.broadcast %cst_16 : f32 to vector<24x128xf32>
    %48 = arith.maximumf %46, %47 : vector<24x128xf32>
    %49 = arith.mulf %0, %43 : vector<24x128xf32>
    %cst_17 = arith.constant 1.000000e+00 : f32
    %50 = vector.broadcast %cst_17 : f32 to vector<24x128xf32>
    %51 = arith.subf %50, %0 : vector<24x128xf32>
    %52 = arith.mulf %51, %48 : vector<24x128xf32>
    %53 = arith.addf %49, %52 : vector<24x128xf32>
    %cst_18 = arith.constant 0.000000e+00 : f32
    %54 = vector.broadcast %cst_18 : f32 to vector<24x128xf32>
    %55 = arith.subf %54, %53 : vector<24x128xf32>
    %cst_19 = arith.constant 0.000000e+00 : f32
    %56 = vector.broadcast %cst_19 : f32 to vector<24x128xf32>
    %57 = arith.select %40, %55, %56 : vector<24x128xi1>, vector<24x128xf32>
    %58 = vector.shape_cast %57 : vector<24x128xf32> to vector<1x24x128xf32>
    %cst_20 = arith.constant dense<0.000000e+00> : vector<1xf32>
    %59 = vector.multi_reduction <add>, %58, %cst_20 [1, 2] : vector<1x24x128xf32> to vector<1xf32>
    %60 = vector.shape_cast %59 : vector<1xf32> to vector<1x1x1xf32>
    %61 = vector.extract %60[0, 0, 0] : f32 from vector<1x1x1xf32>
    %c0_21 = arith.constant 0 : index
    %62 = memref.load %arg2[%c0_21] : memref<1xf32, #tpu.memory_space<smem>>
    memref.store %61, %arg2[%c0_21] : memref<1xf32, #tpu.memory_space<smem>>
    return
  }
}

</mosaic_0001>

<bundles_post_ra>
// kernel: tpu_custom_call.1
= control target key start
LH: loop header
LB: loop body
LE: loop exit
PB: predicated region body
PF: predicated region fallthrough
CT: control target
= control target key end

     0   :  { %7 = vsyncpa [#allocation3], 0  ;;  %s2916_s0 = inlined_call_operand.hbm [shape: f32[24,128], index: 0, kind: input, shape index: {}]   ;;  %s2917_s1 = inlined_call_operand.hbm [shape: f32[24,128], index: 1, kind: input, shape index: {}]   ;;  %s2918_s2 = inlined_call_operand.hbm [shape: f32[1], index: 2, kind: output, shape index: {}]  }
   0x1   :  { %8 = vsyncpa [#allocation6], 0 }
   0x2   :  { %9 = vsyncpa [#allocation4], 0  ;;  %s1230_s9 = smov [#allocation2]   ;;  %s1114_s13 = scalar_lea.hbm %s2916_s0, 384 }
   0x3   :  { %s15_s10 = sshll.u32 %s1230_s9, 4  ;;  %p1115_p0 = scmp.ne.s32.totalorder %s2916_s0, %s1114_s13  ;;  %s16_s10 = int_to_ptr.vmem [resolvable:$true] %s15_s10 }
   0x4   :  { %p1118_p1 = scmp.lt.u32.totalorder %s1114_s13, %s2916_s0 }
   0x6   :  { %p1120_p2 = pnand %p1118_p1, %p1115_p0 }
   0x8   :  { %1123 = shalt.err (!%p1120_p2)
}
   0x9   :  { %s1124_s18 = scalar_lea.vmem %s16_s10, 384  ;;  %p1129_p4 = scmp.lt.s32.totalorder %s16_s10, %s16_s10 }
   0xa   :  { %p1125_p3 = scmp.ne.s32.totalorder %s16_s10, %s1124_s18  ;;  %p1130_p5 = scmp.lt.s32.totalorder %s1124_s18, %s1124_s18 }
   0xc   :  { %p1131_p6 = por %p1130_p5, %p1129_p4 }
   0xe   :  { %p1132_p7 = pnand %p1131_p6, %p1125_p3 }
  0x10   :  { %1135 = shalt.err (!%p1132_p7)
}
  0x11   :  { %s1231_s19 = smov 128   ;;  %s1232_s20 = smov 8  }
  0x12   :  { %21 = dma.hbm_to_vmem [thread:$0]  %s2916_s0, 384, %s16_s10, [#allocation3], %s1231_s19, %s1231_s19, %s1232_s20  }
  0x13   :  { %s1233_s23 = smov [#allocation5]   ;;  %s1136_s27 = scalar_lea.hbm %s2917_s1, 384 }
  0x14   :  { %s27_s24 = sshll.u32 %s1233_s23, 4  ;;  %p1137_p8 = scmp.ne.s32.totalorder %s2917_s1, %s1136_s27  ;;  %s28_s24 = int_to_ptr.vmem [resolvable:$true] %s27_s24 }
  0x15   :  { %p1140_p9 = scmp.lt.u32.totalorder %s1136_s27, %s2917_s1 }
  0x17   :  { %p1142_p10 = pnand %p1140_p9, %p1137_p8 }
  0x19   :  { %1145 = shalt.err (!%p1142_p10)
}
  0x1a   :  { %s1146_s4 = scalar_lea.vmem %s28_s24, 384  ;;  %p1151_p12 = scmp.lt.s32.totalorder %s28_s24, %s28_s24 }
  0x1b   :  { %p1147_p11 = scmp.ne.s32.totalorder %s28_s24, %s1146_s4  ;;  %p1152_p13 = scmp.lt.s32.totalorder %s1146_s4, %s1146_s4 }
  0x1d   :  { %p1153_p0 = por %p1152_p13, %p1151_p12 }
  0x1f   :  { %p1154_p1 = pnand %p1153_p0, %p1147_p11 }
  0x21   :  { %1157 = shalt.err (!%p1154_p1)
}
  0x22   :  { %33 = dma.hbm_to_vmem [thread:$0]  %s2917_s1, 384, %s28_s24, [#allocation6], %s1231_s19, %s1231_s19, %s1232_s20  }
  0x23   :  { %1196 = dma.done.wait [#allocation3], 384  }
  0x24   :  { %1197 = vsyncadd [#allocation3], 4294966912 }
  0x25   :  { %1198 = dma.done.wait [#allocation6], 384  }
  0x26   :  { %1199 = vsyncadd [#allocation6], 4294966912  ;;  %v64_v0 = vlaneseq  ;;  %v1289_v5 = vld [vmem:[#allocation5] sm:$0xff]  ;;  %v1291_v6 = vld [vmem:[#allocation5 + $0x8] sm:$0xff]  ;;  %v2990_v19 = vmov 0  ;;  %v2993_v20 = vmov 0 }
  0x27   :  { %2983 = vst [vmem:[#allocation12_spill] sm:$0xff] %v1289_v5  ;;  %2984 = vst [vmem:[#allocation13_spill] sm:$0xff] %v1291_v6  ;;  %v1293_v7 = vld [vmem:[#allocation5 + $0x10] sm:$0xff]  ;;  %v43_v8 = vld [vmem:[#allocation2] sm:$0xff]  ;;  %vm93_vm7 = vcmp.gt.f32.partialorder %v1289_v5, 0.5  ;;  %vm94_vm9 = vcmp.gt.f32.partialorder %v1291_v6, 0.5 }
  0x28   :  { %v1279_v1 = vshrl.u32 %v64_v0, 7  ;;  %v69_v2 = vand.u32 127, %v64_v0  ;;  %2985 = vst [vmem:[#allocation14_spill] sm:$0xff] %v1293_v7  ;;  %v44_v9 = vld [vmem:[#allocation2 + $0x8] sm:$0xff]  ;;  %v45_v10 = vld [vmem:[#allocation2 + $0x10] sm:$0xff]  ;;  %v46_v11 = vsub.f32 0.0, %v43_v8 }
  0x29   :  { %v47_v12 = vsub.f32 0.0, %v44_v9  ;;  %v48_v13 = vsub.f32 0.0, %v45_v10  ;;  %vm95_vm10 = vcmp.gt.f32.partialorder %v1293_v7, 0.5  ;;  %v1234_v21 = vmov 0   ;;  %s1379_s1 = smov 0  }
  0x2a   :  { %2980 = vst [vmem:[#allocation11_spill] sm:$0xff] %v1279_v1  ;;  %v67_v3 = vadd.s32 16, %v1279_v1  ;;  %vm70_vm0 = vcmp.ge.s32.totalorder %v1279_v1, 1  ;;  %vm79_vm1 = vcmp.ge.s32.totalorder %v69_v2, 1  ;;  %vm83_vm2 = vcmp.le.s32.totalorder %v69_v2, 16 }
  0x2b   :  { %vm80_vm3 = vmand %vm70_vm0, %vm79_vm1  ;;  %v49_v15 = vmul.f32 1.442695, %v46_v11  ;;  %v51_v16 = vmul.f32 1.442695, %v47_v12  ;;  %v53_v17 = vmul.f32 1.442695, %v48_v13 }
  0x2c   :  { %vm75_vm4 = vcmp.le.s32.totalorder %v67_v3, 16  ;;  %vm1285_vm5 = vmand %vm80_vm3, %vm83_vm2  ;;  %v2996_v23 = vmov 0  ;;  %v3002_v35 = vmov 0  ;;  %v3005_v36 = vmov 0 }
  0x2d   :  { %vm82_vm6 = vmand %vm75_vm4, %vm79_vm1  ;;  %1090 = vpow2.f32 %v49_v15  ;;  %v3008_v38 = vmov 0 }
  0x2e   :  { %vm1299_vm8 = vmand %vm79_vm1, %vm83_vm2  ;;  %1092 = vpow2.f32 %v51_v16 }
  0x2f   :  { %vm1306_vm11 = vmand %vm82_vm6, %vm83_vm2  ;;  %1094 = vpow2.f32 %v53_v17 }
  0x30   :  { %vm1312_vm12 = vmand %vm93_vm7, %vm1285_vm5 }
  0x31   :  { %v2991_v19 = vsel %vm1312_vm12, 4294967295, %v2990_v19  ;;  %vm1318_vm13 = vmand %vm94_vm9, %vm1299_vm8  ;;  %v99_v22 = vsel %vm1312_vm12, 1, %v1234_v21  }
  0x32   :  { %2992 = vst [vmem:[#allocation15_spill] sm:$0xff] %v2991_v19  ;;  %v2994_v20 = vsel %vm1318_vm13, 4294967295, %v2993_v20  ;;  %vm1326_vm14 = vmand %vm95_vm10, %vm1306_vm11  ;;  %v100_v24 = vsel %vm1318_vm13, 1, %v1234_v21  }
  0x33   :  { %2995 = vst [vmem:[#allocation16_spill] sm:$0xff] %v2994_v20  ;;  %v2997_v23 = vsel %vm1326_vm14, 4294967295, %v2996_v23  ;;  %v101_v25 = vsel %vm1326_vm14, 1, %v1234_v21  }
  0x34   :  { %2998 = vst [vmem:[#allocation17_spill] sm:$0xff] %v2997_v23 }
  0x37   :  { %v1091_v26 = vpop.eup %1090 }
  0x38   :  { %v1093_v27 = vpop.eup %1092  ;;  %v55_v28 = vadd.f32 1.0, %v1091_v26 }
  0x39   :  { %v1095_v29 = vpop.eup %1094  ;;  %v56_v30 = vadd.f32 1.0, %v1093_v27 }
  0x3a   :  { %v57_v31 = vadd.f32 1.0, %v1095_v29  ;;  %1096 = vrcp.f32 %v55_v28 }
  0x3b   :  { %1098 = vrcp.f32 %v56_v30 }
  0x3c   :  { %1100 = vrcp.f32 %v57_v31 }
  0x44   :  { %v1334_v32 = vpop.eup %1096 }
  0x45   :  { %2999 = vst [vmem:[#allocation18_spill] sm:$0xff] %v1334_v32  ;;  %v1336_v33 = vpop.eup %1098  ;;  %vm87_vm15 = vcmp.gt.f32.partialorder %v1334_v32, 0.5 }
  0x46   :  { %3000 = vst [vmem:[#allocation19_spill] sm:$0xff] %v1336_v33  ;;  %v1339_v34 = vpop.eup %1100  ;;  %vm88_vm0 = vcmp.gt.f32.partialorder %v1336_v33, 0.5  ;;  %vm1344_vm1 = vmand %vm87_vm15, %vm1285_vm5 }
  0x47   :  { %3001 = vst [vmem:[#allocation20_spill] sm:$0xff] %v1339_v34  ;;  %v3003_v35 = vsel %vm1344_vm1, 4294967295, %v3002_v35  ;;  %vm89_vm2 = vcmp.gt.f32.partialorder %v1339_v34, 0.5  ;;  %vm1351_vm3 = vmand %vm88_vm0, %vm1299_vm8  ;;  %v102_v37 = vsel %vm1344_vm1, 1, %v1234_v21  }
  0x48   :  { %3004 = vst [vmem:[#allocation21_spill] sm:$0xff] %v3003_v35  ;;  %v3006_v36 = vsel %vm1351_vm3, 4294967295, %v3005_v36  ;;  %vm1359_vm4 = vmand %vm89_vm2, %vm1306_vm11  ;;  %v103_v39 = vsel %vm1351_vm3, 1, %v1234_v21  }
  0x49   :  { %3007 = vst [vmem:[#allocation22_spill] sm:$0xff] %v3006_v36  ;;  %v3009_v38 = vsel %vm1359_vm4, 4294967295, %v3008_v38  ;;  %v104_v40 = vsel %vm1359_vm4, 1, %v1234_v21  }
  0x4a   :  { %3010 = vst [vmem:[#allocation23_spill] sm:$0xff] %v3009_v38 }
  0x4b LB: > { %v3011_v1 = vld [vmem:[#allocation11_spill] sm:$0xff]  ;;  %3012 = vst [vmem:[#allocation24_spill] sm:$0xff] %v1204_v40  ;;  %3013 = vst [vmem:[#allocation25_spill] sm:$0xff] %v1208_v39  ;;  %v117_v41 = vrot.slane %v1224_v22, 7  ;;  %v119_v42 = vrot.slane %v1216_v25, 7  ;;  %v118_v43 = vrot.slane %v1220_v24, 7  ;;  %v1204_v40 = vphi %v104_v40, %v3309_v40   ;;  %s1228_s1 = sphi %s1379_s1, %s110_s1   ;;  %v1224_v22 = vphi %v99_v22, %v3314_v22   ;;  %v1220_v24 = vphi %v100_v24, %v3313_v24   ;;  %v1216_v25 = vphi %v101_v25, %v3312_v25   ;;  %v1212_v37 = vphi %v102_v37, %v3311_v37   ;;  %v1208_v39 = vphi %v103_v39, %v3310_v39  }
  0x4c   : > { %vm2931_vm5 = vcmp.lt.s32.totalorder %v3011_v1, 1  ;;  %v317_v46 = vrot.slane %v1212_v37, 7  ;;  %s1235_s6 = smov 127   ;;  %v319_v47 = vrot.slane %v1204_v40, 7  ;;  %v318_v49 = vrot.slane %v1208_v39, 7  ;;  %s1236_s7 = smov 1  }
  0x4d   : > { %v1408_v44 = vsel %vm2931_vm5, %v119_v42, %v117_v41  ;;  %v1412_v45 = vsel %vm2931_vm5, %v118_v43, %v119_v42  ;;  %v1422_v48 = vsel %vm2931_vm5, %v117_v41, %v118_v43  ;;  %v124_v53 = vrot.slane %v1224_v22, 1  ;;  %s110_s1 = sadd.s32 1, %s1228_s1  }
  0x4e   : > { %143 = vrot.lane.b32.xlu0 %v1408_v44, %s1235_s6  ;;  %147 = vrot.lane.b32.xlu1 %v1412_v45, %s1235_s6  ;;  %v1427_v50 = vsel %vm2931_vm5, %v319_v47, %v317_v46  ;;  %v1435_v51 = vsel %vm2931_vm5, %v317_v46, %v318_v49  ;;  %v1439_v52 = vsel %vm2931_vm5, %v318_v49, %v319_v47  ;;  %v125_v54 = vrot.slane %v1220_v24, 1  ;;  %p107_p2 = scmp.ge.s32.totalorder %s110_s1, 9  }
  0x4f   : > { %v126_v55 = vrot.slane %v1216_v25, 1  ;;  %vm2930_vm6 = vcmp.lt.s32.totalorder %v3011_v1, 7  ;;  %v323_v58 = vrot.slane %v1212_v37, 1  ;;  %v324_v59 = vrot.slane %v1208_v39, 1  ;;  %s1158_s11 = scalar_lea.hbm (%p107_p2), %s2918_s2, 16 }
  0x50   : > { %v1463_v56 = vsel %vm2930_vm6, %v124_v53, %v125_v54  ;;  %v325_v62 = vrot.slane %v1204_v40, 1  ;;  %v188_v21 = vsub.s32 1, %v1408_v44  ;;  %v190_v26 = vsub.s32 1, %v1412_v45  ;;  %p1159_p3 = scmp.ne.s32.totalorder (%p107_p2), %s2918_s2, %s1158_s11  ;;  %p1162_p4 = scmp.lt.u32.totalorder (%p107_p2), %s1158_s11, %s2918_s2 }
  0x51   : > { %v1467_v57 = vsel %vm2930_vm6, %v125_v54, %v126_v55  ;;  %v1477_v60 = vsel %vm2930_vm6, %v126_v55, %v124_v53  ;;  %v1481_v61 = vsel %vm2930_vm6, %v323_v58, %v324_v59  ;;  %v189_v29 = vsub.s32 1, %v1422_v48 }
  0x52   : > { %145 = vrot.lane.b32.xlu0 %v1422_v48, %s1235_s6  ;;  %341 = vrot.lane.b32.xlu1 %v1427_v50, %s1235_s6  ;;  %v1490_v63 = vsel %vm2930_vm6, %v324_v59, %v325_v62  ;;  %v1494_v0 = vsel %vm2930_vm6, %v325_v62, %v323_v58  ;;  %v386_v30 = vsub.s32 1, %v1427_v50  ;;  %v387_v31 = vsub.s32 1, %v1435_v51  ;;  %p1164_p5 = pnand (%p107_p2), %p1162_p4, %p1159_p3 }
  0x53   : > { %v388_v41 = vsub.s32 1, %v1439_v52  ;;  %vm257_vm7 = vcmp.gt.s32.totalorder %v1408_v44, 0  ;;  %vm258_vm8 = vcmp.gt.s32.totalorder %v1422_v48, 0  ;;  %vm263_vm9 = vcmp.gt.s32.totalorder %v1463_v56, 0 }
  0x54   : > { %vm3022_vm5 = vcmp.gt.s32.totalorder %v1467_v57, 0  ;;  %vm3074_vm1 = vcmp.gt.s32.totalorder %v1490_v63, 0 }
  0x56   : > { %343 = vrot.lane.b32.xlu0 %v1435_v51, %s1235_s6  ;;  %345 = vrot.lane.b32.xlu1 %v1439_v52, %s1235_s6 }
  0x5a   : > { %131 = vrot.lane.b32.xlu0 %v1224_v22, %s1235_s6  ;;  %133 = vrot.lane.b32.xlu1 %v1220_v24, %s1235_s6 }
  0x5e   : > { %135 = vrot.lane.b32.xlu0 %v1216_v25, %s1235_s6  ;;  %329 = vrot.lane.b32.xlu1 %v1212_v37, %s1235_s6 }
  0x62   : > { %331 = vrot.lane.b32.xlu0 %v1208_v39, %s1235_s6  ;;  %333 = vrot.lane.b32.xlu1 %v1204_v40, %s1235_s6 }
  0x66   : > { %155 = vrot.lane.b32.xlu0 %v1463_v56, %s1235_s6  ;;  %157 = vrot.lane.b32.xlu1 %v1467_v57, %s1235_s6 }
  0x6a   : > { %159 = vrot.lane.b32.xlu0 %v1477_v60, %s1235_s6  ;;  %353 = vrot.lane.b32.xlu1 %v1481_v61, %s1235_s6 }
  0x6e   : > { %355 = vrot.lane.b32.xlu0 %v1490_v63, %s1235_s6  ;;  %357 = vrot.lane.b32.xlu1 %v1494_v0, %s1235_s6 }
  0x72   : > { %161 = vrot.lane.b32.xlu0 %v1463_v56, %s1236_s7  ;;  %163 = vrot.lane.b32.xlu1 %v1467_v57, %s1236_s7 }
  0x76   : > { %165 = vrot.lane.b32.xlu0 %v1477_v60, %s1236_s7  ;;  %359 = vrot.lane.b32.xlu1 %v1481_v61, %s1236_s7 }
  0x7a   : > { %361 = vrot.lane.b32.xlu0 %v1490_v63, %s1236_s7  ;;  %363 = vrot.lane.b32.xlu1 %v1494_v0, %s1236_s7 }
  0x7e   : > { %137 = vrot.lane.b32.xlu0 %v1224_v22, %s1236_s7  ;;  %139 = vrot.lane.b32.xlu1 %v1220_v24, %s1236_s7 }
  0x82   : > { %141 = vrot.lane.b32.xlu0 %v1216_v25, %s1236_s7  ;;  %335 = vrot.lane.b32.xlu1 %v1212_v37, %s1236_s7 }
  0x86   : > { %337 = vrot.lane.b32.xlu0 %v1208_v39, %s1236_s7  ;;  %339 = vrot.lane.b32.xlu1 %v1204_v40, %s1236_s7 }
  0x8a   : > { %149 = vrot.lane.b32.xlu0 %v1408_v44, %s1236_s7  ;;  %151 = vrot.lane.b32.xlu1 %v1422_v48, %s1236_s7 }
  0x8e   : > { %153 = vrot.lane.b32.xlu0 %v1412_v45, %s1236_s7  ;;  %347 = vrot.lane.b32.xlu1 %v1427_v50, %s1236_s7 }
  0x92   : > { %349 = vrot.lane.b32.xlu0 %v1435_v51, %s1236_s7  ;;  %351 = vrot.lane.b32.xlu1 %v1439_v52, %s1236_s7 }
  0xc0   : > { %v144_v2 = vpop.permute.xlu0 %143  ;;  %v148_v3 = vpop.permute.xlu1 %147 }
  0xc1   : > { %v167_v49 = vadd.s32 %v144_v2, %v1408_v44  ;;  %v191_v53 = vmul.u32 %v188_v21, %v144_v2  ;;  %v194_v58 = vsub.s32 1, %v144_v2  ;;  %v169_v59 = vadd.s32 %v148_v3, %v1412_v45 }
  0xc2   : > { %v193_v62 = vmul.u32 %v190_v26, %v148_v3  ;;  %v196_v46 = vsub.s32 1, %v148_v3 }
  0xc4   : > { %v146_v4 = vpop.permute.xlu0 %145  ;;  %v342_v8 = vpop.permute.xlu1 %341 }
  0xc5   : > { %v195_v23 = vsub.s32 1, %v146_v4  ;;  %v168_v47 = vadd.s32 %v146_v4, %v1422_v48  ;;  %v192_v7 = vmul.u32 %v189_v29, %v146_v4  ;;  %v389_v21 = vmul.u32 %v386_v30, %v342_v8 }
  0xc6   : > { %v365_v54 = vadd.s32 %v342_v8, %v1427_v50  ;;  %v392_v20 = vsub.s32 1, %v342_v8 }
  0xc8   : > { %v1536_v9 = vpop.permute.xlu0 %343  ;;  %v1538_v10 = vpop.permute.xlu1 %345 }
  0xc9   : > { %v366_v55 = vadd.s32 %v1536_v9, %v1435_v51  ;;  %v390_v6 = vmul.u32 %v387_v31, %v1536_v9  ;;  %v393_v3 = vsub.s32 1, %v1536_v9  ;;  %v367_v4 = vadd.s32 %v1538_v10, %v1439_v52 }
  0xca   : > { %v391_v8 = vmul.u32 %v388_v41, %v1538_v10  ;;  %v394_v29 = vsub.s32 1, %v1538_v10 }
  0xcc   : > { %v1540_v11 = vpop.permute.xlu0 %131  ;;  %v1542_v12 = vpop.permute.xlu1 %133 }
  0xcd   : > { %v197_v2 = vmul.u32 %v194_v58, %v1540_v11  ;;  %v198_v26 = vmul.u32 %v195_v23, %v1542_v12  ;;  %vm260_vm10 = vcmp.gt.s32.totalorder %v1540_v11, 0  ;;  %vm261_vm15 = vcmp.gt.s32.totalorder %v1542_v12, 0 }
  0xce   : > { %v170_v31 = vadd.s32 %v167_v49, %v1540_v11  ;;  %v203_v41 = vsub.s32 1, %v1540_v11  ;;  %v171_v19 = vadd.s32 %v168_v47, %v1542_v12  ;;  %v204_v5 = vsub.s32 1, %v1542_v12  ;;  %vm1632_vm0 = vmand %vm257_vm7, %vm260_vm10 }
  0xcf   : > { %v200_v10 = vadd.s32 %v197_v2, %v191_v53  ;;  %vm1654_vm7 = vmand %vm258_vm8, %vm261_vm15 }
  0xd0   : > { %v1544_v13 = vpop.permute.xlu0 %135  ;;  %v1546_v14 = vpop.permute.xlu1 %329  ;;  %vm1664_vm11 = vmand %vm1632_vm0, %vm263_vm9 }
  0xd1   : > { %v199_v23 = vmul.u32 %v196_v46, %v1544_v13  ;;  %v395_v9 = vmul.u32 %v392_v20, %v1546_v14  ;;  %v201_v46 = vadd.s32 %v198_v26, %v192_v7  ;;  %v172_v20 = vadd.s32 %v169_v59, %v1544_v13  ;;  %vm1678_vm0 = vmand %vm260_vm10, %vm263_vm9 }
  0xd2   : > { %v205_v53 = vsub.s32 1, %v1544_v13  ;;  %v368_v47 = vadd.s32 %v365_v54, %v1546_v14  ;;  %v401_v7 = vsub.s32 1, %v1546_v14  ;;  %vm1689_vm8 = vmand %vm1654_vm7, %vm3022_vm5  ;;  %vm3025_vm9 = vcmp.gt.s32.totalorder %v1544_v13, 0 }
  0xd3   : > { %v202_v49 = vadd.s32 %v199_v23, %v193_v62  ;;  %v398_v35 = vadd.s32 %v395_v9, %v389_v21  ;;  %vm3026_vm10 = vcmp.gt.s32.totalorder %v1412_v45, 0  ;;  %vm3029_vm7 = vmmov %vm3022_vm5 }
  0xd4   : > { %v1548_v15 = vpop.permute.xlu0 %331  ;;  %v1550_v16 = vpop.permute.xlu1 %333  ;;  %vm1704_vm2 = vmand %vm3026_vm10, %vm3025_vm9  ;;  %vm3032_vm9 = vcmp.gt.s32.totalorder %v1546_v14, 0  ;;  %vm3033_vm10 = vcmp.gt.s32.totalorder %v1427_v50, 0 }
  0xd5   : > { %v396_v38 = vmul.u32 %v393_v3, %v1548_v15  ;;  %v397_v36 = vmul.u32 %v394_v29, %v1550_v16  ;;  %v369_v23 = vadd.s32 %v366_v55, %v1548_v15  ;;  %v402_v54 = vsub.s32 1, %v1548_v15  ;;  %vm1716_vm6 = vmand %vm261_vm15, %vm3029_vm7 }
  0xd6   : > { %v370_v34 = vadd.s32 %v367_v4, %v1550_v16  ;;  %v403_v21 = vsub.s32 1, %v1550_v16  ;;  %vm1727_vm5 = vmand %vm3033_vm10, %vm3032_vm9  ;;  %vm3037_vm15 = vcmp.gt.s32.totalorder %v1477_v60, 0  ;;  %vm2947_vm9 = vmmov 1  }
  0xd7   : > { %v399_v55 = vadd.s32 %v396_v38, %v390_v6  ;;  %v400_v4 = vadd.s32 %v397_v36, %v391_v8  ;;  %v3036_v6 = vsub.s32 1, %v1463_v56  ;;  %vm1739_vm7 = vmand %vm1704_vm2, %vm3037_vm15  ;;  %vm3055_vm4 = vcmp.gt.s32.totalorder %v1548_v15, 0 }
  0xd8   : > { %v1552_v17 = vpop.permute.xlu0 %155  ;;  %v1554_v18 = vpop.permute.xlu1 %157  ;;  %vm1756_vm2 = vmxor %vm1664_vm11, %vm2947_vm9  ;;  %vm3048_vm9 = vcmp.gt.s32.totalorder %v1481_v61, 0  ;;  %vm3056_vm11 = vcmp.gt.s32.totalorder %v1435_v51, 0 }
  0xd9   : > { %v206_v3 = vmul.u32 %v203_v41, %v1552_v17  ;;  %v212_v59 = vsub.s32 1, %v1552_v17  ;;  %v207_v29 = vmul.u32 %v204_v5, %v1554_v18  ;;  %v213_v62 = vsub.s32 1, %v1554_v18  ;;  %vm3043_vm10 = vmmov %vm3037_vm15 }
  0xda   : > { %v173_v9 = vadd.s32 %v170_v31, %v1552_v17  ;;  %v174_v17 = vadd.s32 %v171_v19, %v1554_v18  ;;  %vm3044_vm15 = vcmp.gt.s32.totalorder %v1544_v13, 0  ;;  %vm1780_vm13 = vmand %vm1727_vm5, %vm3048_vm9  ;;  %vm3060_vm5 = vcmp.gt.s32.totalorder %v1490_v63, 0 }
  0xdb   : > { %v209_v36 = vadd.s32 %v206_v3, %v200_v10  ;;  %v215_v38 = vmul.u32 %v212_v59, %v1463_v56  ;;  %v210_v8 = vadd.s32 %v207_v29, %v201_v46  ;;  %vm1764_vm14 = vmand %vm3044_vm15, %vm3043_vm10  ;;  %vm3052_vm15 = vcmp.gt.s32.totalorder %v1546_v14, 0 }
  0xdc   : > { %v1558_v27 = vpop.permute.xlu0 %159  ;;  %v1560_v28 = vpop.permute.xlu1 %353  ;;  %vm3051_vm10 = vmmov %vm3048_vm9  ;;  %v3059_v14 = vsub.s32 1, %v1481_v61  ;;  %v3108_v13 = vmov 0 }
  0xdd   : > { %v208_v5 = vmul.u32 %v205_v53, %v1558_v27  ;;  %v214_v41 = vsub.s32 1, %v1558_v27  ;;  %v404_v32 = vmul.u32 %v401_v7, %v1560_v28  ;;  %v410_v1 = vsub.s32 1, %v1560_v28  ;;  %vm1788_vm12 = vmand %vm3052_vm15, %vm3051_vm10 }
  0xde   : > { %v216_v53 = vmul.u32 %v213_v62, %v1467_v57  ;;  %v175_v10 = vadd.s32 %v172_v20, %v1558_v27  ;;  %v371_v7 = vadd.s32 %v368_v47, %v1560_v28  ;;  %vm1796_vm3 = vmand %vm3056_vm11, %vm3055_vm4 }
  0xdf   : > { %v211_v18 = vadd.s32 %v208_v5, %v202_v49  ;;  %v217_v11 = vmul.u32 %v214_v41, %v1477_v60  ;;  %v407_v28 = vadd.s32 %v404_v32, %v398_v35  ;;  %v413_v20 = vmul.u32 %v410_v1, %v1481_v61  ;;  %vm3061_vm9 = vmmov %vm3055_vm4 }
  0xe0   : > { %v1575_v42 = vpop.permute.xlu0 %355  ;;  %v1577_v43 = vpop.permute.xlu1 %357  ;;  %v176_v1 = vadd.s32 %v173_v9, %v1463_v56  ;;  %v218_v35 = vadd.s32 %v215_v38, %v209_v36  ;;  %v219_v5 = vadd.s32 %v216_v53, %v210_v8  ;;  %vm1810_vm10 = vmand %vm3061_vm9, %vm3060_vm5  ;;  %vm3067_vm5 = vmmov 1  }
  0xe1   : > { %v411_v19 = vsub.s32 1, %v1575_v42  ;;  %v405_v46 = vmul.u32 %v402_v54, %v1575_v42  ;;  %v406_v3 = vmul.u32 %v403_v21, %v1577_v43  ;;  %v412_v59 = vsub.s32 1, %v1577_v43  ;;  %vm1839_vm9 = vmxor %vm1689_vm8, %vm3067_vm5 }
  0xe2   : > { %v372_v49 = vadd.s32 %v369_v23, %v1575_v42  ;;  %v373_v32 = vadd.s32 %v370_v34, %v1577_v43  ;;  %v177_v42 = vadd.s32 %v174_v17, %v1467_v57  ;;  %v178_v21 = vadd.s32 %v175_v10, %v1477_v60 }
  0xe3   : > { %v414_v54 = vmul.u32 %v411_v19, %v1490_v63  ;;  %v374_v34 = vadd.s32 %v371_v7, %v1481_v61  ;;  %v408_v12 = vadd.s32 %v405_v46, %v399_v55  ;;  %v409_v9 = vadd.s32 %v406_v3, %v400_v4 }
  0xe4   : > { %v1595_v30 = vpop.permute.xlu0 %161  ;;  %v1597_v58 = vpop.permute.xlu1 %163  ;;  %v415_v41 = vmul.u32 %v412_v59, %v1494_v0  ;;  %v3040_v17 = vsub.s32 1, %v1467_v57  ;;  %v220_v55 = vadd.s32 %v217_v11, %v211_v18  ;;  %v416_v4 = vadd.s32 %v413_v20, %v407_v28 }
  0xe5   : > { %v224_v36 = vmul.u32 %v3036_v6, %v1595_v30  ;;  %v1747_v53 = vadd.s32 %v372_v49, %v1490_v63  ;;  %v179_v19 = vadd.s32 %v176_v1, %v1595_v30  ;;  %v3047_v18 = vsub.s32 1, %v1477_v60  ;;  %v3156_v49 = vld [vmem:[#allocation11_spill] sm:$0xff] }
  0xe6   : > { %v225_v8 = vmul.u32 %v3040_v17, %v1597_v58  ;;  %v1773_v31 = vadd.s32 %v373_v32, %v1494_v0  ;;  %v230_v59 = vsub.s32 1, %v1595_v30  ;;  %v180_v11 = vadd.s32 %v177_v42, %v1597_v58 }
  0xe7   : > { %v231_v28 = vsub.s32 1, %v1597_v58  ;;  %v227_v62 = vadd.s32 %v224_v36, %v218_v35  ;;  %v1814_v32 = vadd.s32 %v414_v54, %v408_v12  ;;  %v1816_v30 = vadd.s32 %v415_v41, %v409_v9 }
  0xe8   : > { %v1616_v2 = vpop.permute.xlu0 %165  ;;  %v1618_v26 = vpop.permute.xlu1 %359  ;;  %v228_v58 = vadd.s32 %v225_v8, %v219_v5  ;;  %v3068_v5 = vmov 0  ;;  %vm3070_vm4 = vcmp.gt.s32.totalorder %v1550_v16, 0  ;;  %v3075_v9 = vmov 0 }
  0xe9   : > { %v226_v46 = vmul.u32 %v3047_v18, %v1616_v2  ;;  %v422_v20 = vmul.u32 %v3059_v14, %v1618_v26  ;;  %v1820_v1 = vadd.s32 %v178_v21, %v1616_v2  ;;  %v3069_v5 = vsel %vm1839_vm9, 4294967295, %v3068_v5  ;;  %vm1861_vm9 = vmand %vm1796_vm3, %vm3074_vm1 }
  0xea   : > { %v232_v43 = vsub.s32 1, %v1616_v2  ;;  %v1853_v12 = vadd.s32 %v374_v34, %v1618_v26  ;;  %v428_v27 = vsub.s32 1, %v1618_v26  ;;  %v3076_v9 = vsel %vm1861_vm9, 4294967295, %v3075_v9  ;;  %vm1904_vm3 = vmxor %vm1739_vm7, %vm3067_vm5 }
  0xeb   : > { %v229_v21 = vadd.s32 %v226_v46, %v220_v55  ;;  %v1865_v41 = vadd.s32 %v422_v20, %v416_v4  ;;  %v3077_v2 = vsub.s32 1, %v1490_v63  ;;  %vm3091_vm9 = vcmp.gt.s32.totalorder %v1494_v0, 0 }
  0xec   : > { %v1646_v40 = vpop.permute.xlu0 %361  ;;  %v1648_v39 = vpop.permute.xlu1 %363 }
  0xed   : > { %v423_v6 = vmul.u32 %v3077_v2, %v1646_v40  ;;  %v429_v34 = vsub.s32 1, %v1646_v40 }
  0xf0   : > { %v1696_v47 = vpop.permute.xlu0 %137  ;;  %v1698_v29 = vpop.permute.xlu1 %139 }
  0xf1   : > { %v233_v61 = vmul.u32 %v230_v59, %v1696_v47  ;;  %vm3064_vm11 = vcmp.gt.s32.totalorder %v1696_v47, 0  ;;  %v234_v35 = vmul.u32 %v231_v28, %v1698_v29  ;;  %v182_v36 = vadd.s32 %v179_v19, %v1696_v47 }
  0xf2   : > { %vm1827_vm15 = vmand %vm1678_vm0, %vm3064_vm11  ;;  %vm3071_vm0 = vcmp.gt.s32.totalorder %v1439_v52, 0  ;;  %v239_v8 = vsub.s32 1, %v1696_v47  ;;  %v183_v23 = vadd.s32 %v180_v11, %v1698_v29  ;;  %v240_v46 = vsub.s32 1, %v1698_v29 }
  0xf3   : > { %vm1847_vm11 = vmand %vm3071_vm0, %vm3070_vm4  ;;  %vm3078_vm4 = vcmp.gt.s32.totalorder %v1698_v29, 0  ;;  %v236_v4 = vadd.s32 %v233_v61, %v227_v62  ;;  %v237_v18 = vadd.s32 %v234_v35, %v228_v58  ;;  %v3087_v47 = vmov 0 }
  0xf4   : > { %v1749_v10 = vpop.permute.xlu0 %141  ;;  %v1751_v56 = vpop.permute.xlu1 %335  ;;  %vm1875_vm0 = vmand %vm1716_vm6, %vm3078_vm4  ;;  %vm3083_vm6 = vcmp.gt.s32.totalorder %v1494_v0, 0  ;;  %vm3084_vm4 = vcmp.gt.s32.totalorder %v1550_v16, 0  ;;  %v3088_v47 = vsel %vm1904_vm3, 4294967295, %v3087_v47  ;;  %v3089_v16 = vmov 0 }
  0xf5   : > { %vm1883_vm1 = vmxor %vm1827_vm15, %vm3067_vm5  ;;  %v235_v63 = vmul.u32 %v232_v43, %v1749_v10  ;;  %v431_v14 = vmul.u32 %v428_v27, %v1751_v56  ;;  %v241_v58 = vsub.s32 1, %v1749_v10  ;;  %v437_v33 = vsub.s32 1, %v1751_v56 }
  0xf6   : > { %vm1895_vm8 = vmand %vm3084_vm4, %vm3083_vm6  ;;  %vm3094_vm4 = vcmp.gt.s32.totalorder %v1749_v10, 0  ;;  %v430_v28 = vsub.s32 1, %v1648_v39  ;;  %v378_v61 = vadd.s32 %v1747_v53, %v1646_v40 }
  0xf7   : > { %vm1911_vm6 = vmxor %vm1875_vm0, %vm3067_vm5  ;;  %v238_v35 = vadd.s32 %v235_v63, %v229_v21  ;;  %v434_v55 = vadd.s32 %v431_v14, %v1865_v41 }
  0xf8   : > { %v1832_v42 = vpop.permute.xlu0 %337  ;;  %v1834_v54 = vpop.permute.xlu1 %339  ;;  %v3090_v16 = vsel %vm1911_vm6, 4294967295, %v3089_v16  ;;  %vm1921_vm7 = vmand %vm1847_vm11, %vm3091_vm9  ;;  %vm3097_vm9 = vcmp.gt.s32.totalorder %v1751_v56, 0 }
  0xf9   : > { %vm1933_vm3 = vmand %vm1764_vm14, %vm3094_vm4  ;;  %vm3100_vm14 = vcmp.gt.s32.totalorder %v1832_v42, 0  ;;  %vm3112_vm0 = vcmp.gt.s32.totalorder %v1834_v54, 0  ;;  %v433_v7 = vmul.u32 %v430_v28, %v1834_v54  ;;  %v439_v17 = vsub.s32 1, %v1834_v54 }
  0xfa   : > { %vm1943_vm11 = vmand %vm1788_vm12, %vm3097_vm9  ;;  %v381_v38 = vadd.s32 %v378_v61, %v1832_v42 }
  0xfb   : > { %vm1953_vm4 = vmand %vm1810_vm10, %vm3100_vm14 }
  0xfc   : > { %v150_v19 = vpop.permute.xlu0 %149  ;;  %v152_v3 = vpop.permute.xlu1 %151  ;;  %vm1962_vm12 = vmxor %vm1780_vm13, %vm3067_vm5 }
  0xfd   : > { %v185_v59 = vadd.s32 %v182_v36, %v150_v19  ;;  %v242_v11 = vmul.u32 %v239_v8, %v150_v19  ;;  %v248_v29 = vsub.s32 1, %v150_v19  ;;  %v243_v20 = vmul.u32 %v240_v46, %v152_v3  ;;  %vm1969_vm10 = vmxor %vm1933_vm3, %vm3067_vm5 }
  0xfe   : > { %v249_v62 = vsub.s32 1, %v152_v3  ;;  %v186_v60 = vadd.s32 %v183_v23, %v152_v3  ;;  %vm1981_vm15 = vmxor %vm1943_vm11, %vm3067_vm5  ;;  %v184_v8 = vadd.s32 %v1820_v1, %v1749_v10  ;;  %v3110_v19 = vmov 0 }
  0xff   : > { %v245_v15 = vadd.s32 %v242_v11, %v236_v4  ;;  %v251_v57 = vmul.u32 %v248_v29, %v1408_v44  ;;  %v246_v27 = vadd.s32 %v243_v20, %v237_v18  ;;  %v3103_v44 = vmov 0  ;;  %vm1990_vm14 = vmxor %vm1953_vm4, %vm3067_vm5 }
 0x100   : > { %v252_v2 = vmul.u32 %v249_v62, %v1422_v48  ;;  %v154_v26 = vpop.permute.xlu0 %153  ;;  %v348_v36 = vpop.permute.xlu1 %347  ;;  %v3104_v44 = vsel %vm1962_vm12, 4294967295, %v3103_v44  ;;  %vm272_vm9 = vcmp.ge.s32.totalorder %v185_v59, 2  ;;  %v3109_v13 = vsel %vm1981_vm15, 4294967295, %v3108_v13  ;;  %vm1998_vm11 = vmand %vm1895_vm8, %vm3112_vm0 }
 0x101   : > { %v254_v21 = vadd.s32 %v251_v57, %v245_v15  ;;  %v244_v48 = vmul.u32 %v241_v58, %v154_v26  ;;  %v250_v63 = vsub.s32 1, %v154_v26  ;;  %v440_v23 = vmul.u32 %v437_v33, %v348_v36 }
 0x102   : > { %v446_v4 = vsub.s32 1, %v348_v36  ;;  %v3111_v19 = vsel %vm1990_vm14, 4294967295, %v3110_v19  ;;  %v255_v46 = vadd.s32 %v252_v2, %v246_v27  ;;  %v426_v3 = vadd.s32 %v423_v6, %v1814_v32  ;;  %v3141_v2 = vld [vmem:[#allocation25_spill] sm:$0xff] }
 0x103   : > { %v247_v10 = vadd.s32 %v244_v48, %v238_v35  ;;  %v253_v1 = vmul.u32 %v250_v63, %v1412_v45  ;;  %v3115_v11 = vsub.s32 1, %v1494_v0  ;;  %vm3116_vm4 = vcmp.gt.s32.totalorder %v1224_v22, 0 }
 0x104   : > { %vm275_vm8 = vmand %vm3116_vm4, %vm272_vm9  ;;  %v350_v20 = vpop.permute.xlu0 %349  ;;  %vm3117_vm0 = vnez %v3076_v9  ;;  %v3118_v45 = vmov 0  ;;  %v432_v0 = vmul.u32 %v429_v34, %v1832_v42  ;;  %vm3120_vm14 = vcmp.le.s32.totalorder %v185_v59, 6  ;;  %v352_v57 = vpop.permute.xlu1 %351 }
 0x105   : > { %v424_v29 = vmul.u32 %v3115_v11, %v1648_v39  ;;  %vm2015_vm3 = vmxor %vm3117_vm0, %vm3067_vm5  ;;  %vm273_vm13 = vcmp.ge.s32.totalorder %v186_v60, 2  ;;  %v187_v32 = vadd.s32 %v184_v8, %v154_v26  ;;  %v438_v6 = vsub.s32 1, %v1832_v42 }
 0x106   : > { %v3119_v45 = vsel %vm2015_vm3, 4294967295, %v3118_v45  ;;  %vm281_vm6 = vmand %vm275_vm8, %vm3120_vm14  ;;  %vm3121_vm9 = vnez %v3088_v47  ;;  %vm3122_vm12 = vcmp.eq.s32.totalorder %v254_v21, 1  ;;  %vm279_vm15 = vcmp.le.s32.totalorder %v186_v60, 6  ;;  %v3147_v47 = vld [vmem:[#allocation24_spill] sm:$0xff] }
 0x107   : > { %vm287_vm0 = vmand %vm281_vm6, %vm3122_vm12  ;;  %v256_v9 = vadd.s32 %v253_v1, %v247_v10  ;;  %v443_v41 = vadd.s32 %v440_v23, %v434_v55  ;;  %v449_v14 = vmul.u32 %v446_v4, %v1427_v50  ;;  %v3123_v34 = vmov 0 }
 0x108   : > { %vm2033_vm14 = vmxor %vm1998_vm11, %vm3067_vm5  ;;  %vm285_vm6 = vcmp.eq.s32.totalorder %v255_v46, 1  ;;  %v380_v50 = vadd.s32 %v1853_v12, %v1751_v56  ;;  %v441_v62 = vmul.u32 %v438_v6, %v350_v20  ;;  %v447_v58 = vsub.s32 1, %v350_v20 }
 0x109   : > { %v3124_v34 = vsel %vm2033_vm14, 4294967295, %v3123_v34  ;;  %vm3125_vm8 = vmand %vm1756_vm2, %vm1883_vm1  ;;  %v427_v15 = vadd.s32 %v424_v29, %v1816_v30  ;;  %vm3128_vm2 = vcmp.gt.s32.totalorder %v1220_v24, 0  ;;  %v3129_v56 = vmov 0 }
 0x10a   : > { %vm2042_vm4 = vmand %vm287_vm0, %vm3125_vm8  ;;  %v383_v40 = vadd.s32 %v380_v50, %v348_v36  ;;  %v435_v53 = vadd.s32 %v432_v0, %v426_v3  ;;  %v452_v12 = vadd.s32 %v449_v14, %v443_v41  ;;  %v450_v35 = vmul.u32 %v447_v58, %v1435_v51 }
 0x10b   : > { %vm276_vm1 = vmand %vm3128_vm2, %vm273_vm13  ;;  %v2067_v30 = vsel %vm2042_vm4, 0, %v1224_v22  ;;  %vm3134_vm4 = vnez %v3090_v16  ;;  %v442_v33 = vmul.u32 %v439_v17, %v352_v57  ;;  %v448_v43 = vsub.s32 1, %v352_v57 }
 0x10c   : > { %vm2059_vm12 = vmxor %vm1921_vm7, %vm3067_vm5  ;;  %vm280_vm5 = vcmp.le.s32.totalorder %v187_v32, 6  ;;  %527 = vrot.lane.b32.xlu0 %v2067_v30, %s1235_s6  ;;  %v444_v22 = vadd.s32 %v441_v62, %v435_v53  ;;  %v379_v60 = vadd.s32 %v1773_v31, %v1648_v39  ;;  %vm467_vm13 = vcmp.gt.s32.totalorder %v1212_v37, 0 }
 0x10d   : > { %v3130_v56 = vsel %vm2059_vm12, 4294967295, %v3129_v56  ;;  %vm282_vm11 = vmand %vm276_vm1, %vm279_vm15  ;;  %vm3133_vm15 = vnez %v3069_v5  ;;  %v384_v5 = vadd.s32 %v381_v38, %v350_v20  ;;  %v436_v16 = vadd.s32 %v433_v7, %v427_v15 }
 0x10e   : > { %vm288_vm7 = vmand %vm282_vm11, %vm285_vm6  ;;  %vm3136_vm6 = vcmp.ge.s32.totalorder %v187_v32, 2  ;;  %vm3137_vm11 = vcmp.gt.s32.totalorder %v1216_v25, 0  ;;  %v453_v39 = vadd.s32 %v450_v35, %v444_v22  ;;  %v451_v31 = vmul.u32 %v448_v43, %v1439_v52 }
 0x10f   : > { %vm3135_vm1 = vmand %vm3133_vm15, %vm3134_vm4  ;;  %vm470_vm15 = vcmp.ge.s32.totalorder %v383_v40, 2  ;;  %v445_v51 = vadd.s32 %v442_v33, %v436_v16  ;;  %vm3148_vm12 = vnez %v3119_v45  ;;  %v521_v46 = vrot.slane %v2067_v30, 1 }
 0x110   : > { %vm312_vm0 = vmand %vm288_vm7, %vm3135_vm1  ;;  %vm3139_vm1 = vcmp.eq.s32.totalorder %v256_v9, 1 }
 0x111   : > { %vm277_vm2 = vmand %vm3137_vm11, %vm3136_vm6  ;;  %v2089_v42 = vsel %vm312_vm0, 0, %v1220_v24  ;;  %vm476_vm6 = vcmp.le.s32.totalorder %v383_v40, 6  ;;  %v382_v24 = vadd.s32 %v379_v60, %v1834_v54 }
 0x112   : > { %vm283_vm14 = vmand %vm277_vm2, %vm280_vm5  ;;  %529 = vrot.lane.b32.xlu1 %v2089_v42, %s1235_s6  ;;  %vm482_vm2 = vcmp.eq.s32.totalorder %v452_v12, 1  ;;  %v516_v48 = vrot.slane %v2089_v42, 7  ;;  %v522_v10 = vrot.slane %v2089_v42, 1 }
 0x113   : > { %vm289_vm8 = vmand %vm283_vm14, %vm3139_vm1  ;;  %vm468_vm14 = vcmp.gt.s32.totalorder %v3141_v2, 0  ;;  %vm471_vm1 = vcmp.ge.s32.totalorder %v384_v5, 2  ;;  %v385_v54 = vadd.s32 %v382_v24, %v352_v57 }
 0x114   : > { %vm3140_vm5 = vmand %vm3121_vm9, %vm1969_vm10  ;;  %vm469_vm9 = vcmp.gt.s32.totalorder %v3147_v47, 0 }
 0x115   : > { %vm313_vm0 = vmand %vm289_vm8, %vm3140_vm5  ;;  %vm477_vm5 = vcmp.le.s32.totalorder %v384_v5, 6  ;;  %vm472_vm10 = vcmp.ge.s32.totalorder %v385_v54, 2 }
 0x116   : > { %vm473_vm11 = vmand %vm467_vm13, %vm470_vm15  ;;  %v2107_v27 = vsel %vm313_vm0, 0, %v1216_v25  ;;  %vm3143_vm13 = vnez %v3104_v44  ;;  %vm3144_vm15 = vnez %v3109_v13  ;;  %v454_v25 = vadd.s32 %v451_v31, %v445_v51 }
 0x117   : > { %vm479_vm4 = vmand %vm473_vm11, %vm476_vm6  ;;  %531 = vrot.lane.b32.xlu0 %v2107_v27, %s1235_s6  ;;  %vm483_vm11 = vcmp.eq.s32.totalorder %v453_v39, 1  ;;  %v517_v36 = vrot.slane %v2107_v27, 7  ;;  %v515_v44 = vrot.slane %v2067_v30, 7  ;;  %v523_v11 = vrot.slane %v2107_v27, 1 }
 0x118   : > { %vm485_vm8 = vmand %vm479_vm4, %vm482_vm2  ;;  %vm478_vm2 = vcmp.le.s32.totalorder %v385_v54, 6 }
 0x119   : > { %vm3145_vm0 = vmand %vm3143_vm13, %vm3144_vm15  ;;  %vm3149_vm13 = vnez %v3111_v19 }
 0x11a   : > { %vm509_vm6 = vmand %vm485_vm8, %vm3145_vm0  ;;  %vm484_vm0 = vcmp.eq.s32.totalorder %v454_v25, 1 }
 0x11b   : > { %vm474_vm7 = vmand %vm468_vm14, %vm471_vm1  ;;  %v2122_v52 = vsel %vm509_vm6, 0, %v1212_v37 }
 0x11c   : > { %3146 = vst [vmem:[#allocation25_spill] sm:$0xff] %v2122_v52  ;;  %vm480_vm3 = vmand %vm474_vm7, %vm477_vm5  ;;  %725 = vrot.lane.b32.xlu1 %v2122_v52, %s1235_s6  ;;  %vm3152_vm5 = vnez %v3130_v56  ;;  %v713_v4 = vrot.slane %v2122_v52, 7  ;;  %v719_v45 = vrot.slane %v2122_v52, 1 }
 0x11d   : > { %vm486_vm4 = vmand %vm480_vm3, %vm483_vm11  ;;  %vm3153_vm3 = vnez %v3124_v34 }
 0x11e   : > { %vm3150_vm8 = vmand %vm3148_vm12, %vm3149_vm13  ;;  %vm3157_vm12 = vcmp.lt.s32.totalorder %v3156_v49, 1 }
 0x11f   : > { %vm510_vm15 = vmand %vm486_vm4, %vm3150_vm8  ;;  %v2161_v21 = vsel %vm3157_vm12, %v517_v36, %v515_v44  ;;  %vm3164_vm8 = vcmp.lt.s32.totalorder %v3156_v49, 7 }
 0x120   : > { %vm475_vm14 = vmand %vm469_vm9, %vm472_vm10  ;;  %v2133_v37 = vsel %vm510_vm15, 0, %v3141_v2  ;;  %v2203_v3 = vsel %vm3164_vm8, %v521_v46, %v522_v10  ;;  %v584_v38 = vsub.s32 1, %v2161_v21 }
 0x121   : > { %3151 = vst [vmem:[#allocation24_spill] sm:$0xff] %v2133_v37  ;;  %vm481_vm7 = vmand %vm475_vm14, %vm478_vm2  ;;  %727 = vrot.lane.b32.xlu0 %v2133_v37, %s1235_s6  ;;  %v714_v23 = vrot.slane %v2133_v37, 7  ;;  %v720_v55 = vrot.slane %v2133_v37, 1 }
 0x122   : > { %vm487_vm1 = vmand %vm481_vm7, %vm484_vm0 }
 0x123   : > { %vm3154_vm6 = vmand %vm3152_vm5, %vm3153_vm3  ;;  %vm653_vm5 = vcmp.gt.s32.totalorder %v2161_v21, 0 }
 0x124   : > { %vm511_vm11 = vmand %vm487_vm1, %vm3154_vm6 }
 0x125   : > { %v2143_v26 = vsel %vm511_vm11, 0, %v3147_v47  ;;  %533 = vrot.lane.b32.xlu0 %v2067_v30, %s1236_s7  ;;  %vm3158_vm10 = vmmov %vm3157_vm12  ;;  %vm659_vm11 = vcmp.gt.s32.totalorder %v2203_v3, 0 }
 0x126   : > { %3155 = vst [vmem:[#allocation26_spill] sm:$0xff] %v2143_v26  ;;  %729 = vrot.lane.b32.xlu1 %v2143_v26, %s1235_s6  ;;  %v2170_v63 = vsel %vm3158_vm10, %v515_v44, %v516_v48  ;;  %vm3159_vm9 = vmmov %vm3158_vm10  ;;  %v715_v8 = vrot.slane %v2143_v26, 7  ;;  %v721_v20 = vrot.slane %v2143_v26, 1 }
 0x127   : > { %v2174_v13 = vsel %vm3159_vm9, %v516_v48, %v517_v36  ;;  %vm3161_vm4 = vmmov %vm3159_vm9  ;;  %v585_v53 = vsub.s32 1, %v2170_v63  ;;  %vm654_vm12 = vcmp.gt.s32.totalorder %v2170_v63, 0 }
 0x128   : > { %3160 = vst [vmem:[#allocation27_spill] sm:$0xff] %v2174_v13  ;;  %v2185_v19 = vsel %vm3161_vm4, %v715_v8, %v713_v4  ;;  %vm3162_vm2 = vmmov %vm3161_vm4  ;;  %v586_v22 = vsub.s32 1, %v2174_v13  ;;  %vm655_vm4 = vcmp.gt.s32.totalorder %v2174_v13, 0 }
 0x129   : > { %537 = vrot.lane.b32.xlu0 %v2107_v27, %s1236_s7  ;;  %v2189_v18 = vsel %vm3162_vm2, %v713_v4, %v714_v23  ;;  %vm3163_vm13 = vmmov %vm3162_vm2  ;;  %v782_v60 = vsub.s32 1, %v2185_v19 }
 0x12a   : > { %535 = vrot.lane.b32.xlu1 %v2089_v42, %s1236_s7  ;;  %v2199_v1 = vsel %vm3163_vm13, %v714_v23, %v715_v8  ;;  %vm3165_vm15 = vmmov %vm3164_vm8  ;;  %v783_v5 = vsub.s32 1, %v2189_v18 }
 0x12b   : > { %v2212_v29 = vsel %vm3165_vm15, %v522_v10, %v523_v11  ;;  %vm3166_vm0 = vmmov %vm3164_vm8  ;;  %v784_v31 = vsub.s32 1, %v2199_v1 }
 0x12c   : > { %v2216_v28 = vsel %vm3166_vm0, %v523_v11, %v521_v46  ;;  %vm3167_vm14 = vmmov %vm3166_vm0  ;;  %vm660_vm3 = vcmp.gt.s32.totalorder %v2212_v29, 0 }
 0x12d   : > { %733 = vrot.lane.b32.xlu0 %v2133_v37, %s1236_s7  ;;  %v2227_v0 = vsel %vm3167_vm14, %v719_v45, %v720_v55  ;;  %vm3168_vm7 = vmmov %vm3166_vm0  ;;  %vm661_vm13 = vcmp.gt.s32.totalorder %v2216_v28, 0 }
 0x12e   : > { %731 = vrot.lane.b32.xlu1 %v2122_v52, %s1236_s7  ;;  %v2231_v32 = vsel %vm3168_vm7, %v720_v55, %v721_v20  ;;  %vm3169_vm1 = vmmov %vm3166_vm0  ;;  %vm851_vm0 = vcmp.gt.s32.totalorder %v2185_v19, 0 }
 0x12f   : > { %v2239_v6 = vsel %vm3169_vm1, %v721_v20, %v719_v45  ;;  %vm2347_vm14 = vmand %vm653_vm5, %vm659_vm11 }
 0x130   : > { %vm2360_vm1 = vmand %vm654_vm12, %vm660_vm3 }
 0x131   : > { %539 = vrot.lane.b32.xlu0 %v2161_v21, %s1235_s6 }
 0x132   : > { %735 = vrot.lane.b32.xlu1 %v2143_v26, %s1236_s7 }
 0x135   : > { %543 = vrot.lane.b32.xlu0 %v2174_v13, %s1235_s6 }
 0x136   : > { %541 = vrot.lane.b32.xlu1 %v2170_v63, %s1235_s6 }
 0x139   : > { %739 = vrot.lane.b32.xlu0 %v2189_v18, %s1235_s6 }
 0x13a   : > { %737 = vrot.lane.b32.xlu1 %v2185_v19, %s1235_s6 }
 0x13d   : > { %551 = vrot.lane.b32.xlu0 %v2203_v3, %s1235_s6 }
 0x13e   : > { %741 = vrot.lane.b32.xlu1 %v2199_v1, %s1235_s6 }
 0x141   : > { %555 = vrot.lane.b32.xlu0 %v2216_v28, %s1235_s6 }
 0x142   : > { %553 = vrot.lane.b32.xlu1 %v2212_v29, %s1235_s6 }
 0x145   : > { %751 = vrot.lane.b32.xlu0 %v2231_v32, %s1235_s6 }
 0x146   : > { %749 = vrot.lane.b32.xlu1 %v2227_v0, %s1235_s6 }
 0x149   : > { %557 = vrot.lane.b32.xlu0 %v2203_v3, %s1236_s7 }
 0x14a   : > { %753 = vrot.lane.b32.xlu1 %v2239_v6, %s1235_s6 }
 0x14d   : > { %561 = vrot.lane.b32.xlu0 %v2216_v28, %s1236_s7 }
 0x14e   : > { %559 = vrot.lane.b32.xlu1 %v2212_v29, %s1236_s7 }
 0x151   : > { %757 = vrot.lane.b32.xlu0 %v2231_v32, %s1236_s7 }
 0x152   : > { %755 = vrot.lane.b32.xlu1 %v2227_v0, %s1236_s7 }
 0x155   : > { %545 = vrot.lane.b32.xlu0 %v2161_v21, %s1236_s7 }
 0x156   : > { %759 = vrot.lane.b32.xlu1 %v2239_v6, %s1236_s7 }
 0x159   : > { %549 = vrot.lane.b32.xlu0 %v2174_v13, %s1236_s7 }
 0x15a   : > { %547 = vrot.lane.b32.xlu1 %v2170_v63, %s1236_s7 }
 0x15d   : > { %745 = vrot.lane.b32.xlu0 %v2189_v18, %s1236_s7 }
 0x15e   : > { %743 = vrot.lane.b32.xlu1 %v2185_v19, %s1236_s7 }
 0x162   : > { %747 = vrot.lane.b32.xlu1 %v2199_v1, %s1236_s7 }
 0x17e   : > { %v2267_v9 = vpop.permute.xlu0 %527 }
 0x17f   : > { %vm656_vm6 = vcmp.gt.s32.totalorder %v2267_v9, 0  ;;  %v599_v25 = vsub.s32 1, %v2267_v9 }
 0x180   : > { %vm2372_vm15 = vmand %vm653_vm5, %vm656_vm6 }
 0x184   : > { %v2269_v41 = vpop.permute.xlu1 %529 }
 0x185   : > { %v600_v47 = vsub.s32 1, %v2269_v41  ;;  %vm657_vm10 = vcmp.gt.s32.totalorder %v2269_v41, 0 }
 0x186   : > { %vm2384_vm3 = vmand %vm654_vm12, %vm657_vm10  ;;  %vm853_vm12 = vcmp.gt.s32.totalorder %v2199_v1, 0 }
 0x189   : > { %v2271_v14 = vpop.permute.xlu0 %531 }
 0x18a   : > { %v601_v36 = vsub.s32 1, %v2271_v14  ;;  %vm658_vm9 = vcmp.gt.s32.totalorder %v2271_v14, 0 }
 0x18b   : > { %vm2395_vm6 = vmand %vm655_vm4, %vm658_vm9 }
 0x18c   : > { %vm2415_vm9 = vmand %vm655_vm4, %vm661_vm13 }
 0x18e   : > { %v2273_v34 = vpop.permute.xlu1 %725 }
 0x18f   : > { %vm854_vm8 = vcmp.gt.s32.totalorder %v2273_v34, 0 }
 0x190   : > { %vm2438_vm4 = vmand %vm851_vm0, %vm854_vm8 }
 0x193   : > { %v2275_v59 = vpop.permute.xlu0 %727 }
 0x194   : > { %vm855_vm7 = vcmp.gt.s32.totalorder %v2275_v59, 0 }
 0x197   : > { %v2279_v62 = vpop.permute.xlu0 %533 }
 0x198   : > { %v2277_v50 = vpop.permute.xlu1 %729  ;;  %vm662_vm2 = vcmp.gt.s32.totalorder %v2279_v62, 0 }
 0x199   : > { %vm2407_vm5 = vmand %vm2372_vm15, %vm662_vm2 }
 0x19a   : > { %vm2428_vm15 = vmand %vm2347_vm14, %vm662_vm2  ;;  %vm3190_vm2 = vmmov 1  }
 0x19b   : > { %v2283_v61 = vpop.permute.xlu0 %537  ;;  %vm2445_vm13 = vmxor %vm2407_vm5, %vm3190_vm2 }
 0x19c   : > { %v2281_v58 = vpop.permute.xlu1 %535  ;;  %vm2971_vm11 = vcmp.gt.s32.totalorder %v2283_v61, 0  ;;  %vm2464_vm5 = vmxor %vm2428_vm15, %vm3190_vm2  ;;  %vm3202_vm15 = vcmp.gt.s32.totalorder %v2189_v18, 0 }
 0x19d   : > { %vm3193_vm14 = vcmp.gt.s32.totalorder %v2281_v58, 0  ;;  %vm2483_vm8 = vmand %vm3202_vm15, %vm855_vm7 }
 0x19e   : > { %vm2453_vm10 = vmand %vm2384_vm3, %vm3193_vm14  ;;  %vm3198_vm3 = vcmp.gt.s32.totalorder %v2227_v0, 0 }
 0x19f   : > { %v2287_v7 = vpop.permute.xlu0 %733  ;;  %vm2472_vm14 = vmand %vm851_vm0, %vm3198_vm3  ;;  %vm3205_vm0 = vcmp.gt.s32.totalorder %v2281_v58, 0 }
 0x1a0   : > { %v2285_v15 = vpop.permute.xlu1 %731  ;;  %vm2491_vm3 = vmand %vm2360_vm1, %vm3205_vm0  ;;  %vm3211_vm1 = vcmp.gt.s32.totalorder %v2231_v32, 0 }
 0x1a1   : > { %vm2500_vm7 = vmxor %vm2453_vm10, %vm3190_vm2 }
 0x1a2   : > { %vm2508_vm0 = vmand %vm3202_vm15, %vm3211_vm1  ;;  %vm3220_vm1 = vcmp.gt.s32.totalorder %v2277_v50, 0 }
 0x1a3   : > { %v540_v57 = vpop.permute.xlu0 %539  ;;  %vm2520_vm10 = vmand %vm2395_vm6, %vm2971_vm11  ;;  %vm3228_vm6 = vcmp.gt.s32.totalorder %v2239_v6, 0 }
 0x1a4   : > { %v2289_v17 = vpop.permute.xlu1 %735  ;;  %v590_v43 = vsub.s32 1, %v540_v57  ;;  %v563_v4 = vadd.s32 %v540_v57, %v2161_v21  ;;  %vm2530_vm15 = vmxor %vm2491_vm3, %vm3190_vm2  ;;  %vm3223_vm3 = vcmp.gt.s32.totalorder %v2283_v61, 0 }
 0x1a5   : > { %vm2540_vm11 = vmand %vm853_vm12, %vm3220_vm1 }
 0x1a6   : > { %v593_v46 = vmul.u32 %v590_v43, %v2267_v9  ;;  %v587_v43 = vmul.u32 %v584_v38, %v540_v57  ;;  %v566_v38 = vadd.s32 %v563_v4, %v2267_v9  ;;  %vm2556_vm1 = vmxor %vm2520_vm10, %vm3190_vm2  ;;  %vm3232_vm10 = vcmp.gt.s32.totalorder %v2285_v15, 0 }
 0x1a7   : > { %v544_v40 = vpop.permute.xlu0 %543 }
 0x1a8   : > { %v542_v56 = vpop.permute.xlu1 %541  ;;  %v592_v49 = vsub.s32 1, %v544_v40  ;;  %v565_v45 = vadd.s32 %v544_v40, %v2174_v13  ;;  %v596_v48 = vadd.s32 %v593_v46, %v587_v43  ;;  %v589_v44 = vmul.u32 %v586_v22, %v544_v40 }
 0x1a9   : > { %v591_v24 = vsub.s32 1, %v542_v56  ;;  %v564_v55 = vadd.s32 %v542_v56, %v2170_v63  ;;  %v588_v35 = vmul.u32 %v585_v53, %v542_v56 }
 0x1aa   : > { %v595_v12 = vmul.u32 %v592_v49, %v2271_v14  ;;  %v568_v11 = vadd.s32 %v565_v45, %v2271_v14 }
 0x1ab   : > { %v740_v51 = vpop.permute.xlu0 %739  ;;  %v594_v20 = vmul.u32 %v591_v24, %v2269_v41  ;;  %v567_v53 = vadd.s32 %v564_v55, %v2269_v41 }
 0x1ac   : > { %v738_v39 = vpop.permute.xlu1 %737  ;;  %v789_v16 = vsub.s32 1, %v740_v51  ;;  %v762_v24 = vadd.s32 %v740_v51, %v2189_v18 }
 0x1ad   : > { %v788_v10 = vsub.s32 1, %v738_v39  ;;  %v761_v8 = vadd.s32 %v738_v39, %v2185_v19  ;;  %v597_v33 = vadd.s32 %v594_v20, %v588_v35  ;;  %v785_v56 = vmul.u32 %v782_v60, %v738_v39 }
 0x1ae   : > { %v792_v40 = vmul.u32 %v789_v16, %v2275_v59  ;;  %v598_v60 = vadd.s32 %v595_v12, %v589_v44  ;;  %v786_v39 = vmul.u32 %v783_v5, %v740_v51 }
 0x1af   : > { %v552_v23 = vpop.permute.xlu0 %551  ;;  %v791_v57 = vmul.u32 %v788_v10, %v2273_v34  ;;  %v764_v16 = vadd.s32 %v761_v8, %v2273_v34 }
 0x1b0   : > { %v742_v54 = vpop.permute.xlu1 %741  ;;  %v602_v46 = vmul.u32 %v599_v25, %v552_v23  ;;  %v608_v10 = vsub.s32 1, %v552_v23  ;;  %v765_v25 = vadd.s32 %v762_v24, %v2275_v59  ;;  %v569_v51 = vadd.s32 %v566_v38, %v552_v23 }
 0x1b1   : > { %v790_v22 = vsub.s32 1, %v742_v54  ;;  %v794_v55 = vadd.s32 %v791_v57, %v785_v56  ;;  %v763_v12 = vadd.s32 %v742_v54, %v2199_v1  ;;  %v787_v5 = vmul.u32 %v784_v31, %v742_v54 }
 0x1b2   : > { %v795_v31 = vadd.s32 %v792_v40, %v786_v39  ;;  %v611_v23 = vmul.u32 %v608_v10, %v2203_v3  ;;  %v3180_v56 = vsub.s32 1, %v2273_v34 }
 0x1b3   : > { %v556_v2 = vpop.permute.xlu0 %555  ;;  %v793_v54 = vmul.u32 %v790_v22, %v2277_v50 }
 0x1b4   : > { %v554_v49 = vpop.permute.xlu1 %553  ;;  %v604_v45 = vmul.u32 %v601_v36, %v556_v2  ;;  %v610_v43 = vsub.s32 1, %v556_v2  ;;  %v571_v38 = vadd.s32 %v568_v11, %v556_v2  ;;  %v3185_v2 = vsub.s32 1, %v2275_v59 }
 0x1b5   : > { %v603_v8 = vmul.u32 %v600_v47, %v554_v49  ;;  %v609_v20 = vsub.s32 1, %v554_v49  ;;  %v605_v47 = vadd.s32 %v602_v46, %v596_v48  ;;  %v570_v36 = vadd.s32 %v567_v53, %v554_v49 }
 0x1b6   : > { %v766_v49 = vadd.s32 %v763_v12, %v2277_v50  ;;  %v572_v46 = vadd.s32 %v569_v51, %v2203_v3  ;;  %v613_v26 = vmul.u32 %v610_v43, %v2216_v28  ;;  %v796_v35 = vadd.s32 %v793_v54, %v787_v5 }
 0x1b7   : > { %v752_v57 = vpop.permute.xlu0 %751  ;;  %v606_v39 = vadd.s32 %v603_v8, %v597_v33  ;;  %v612_v44 = vmul.u32 %v609_v20, %v2212_v29  ;;  %v614_v13 = vadd.s32 %v611_v23, %v605_v47  ;;  %v574_v5 = vadd.s32 %v571_v38, %v2216_v28 }
 0x1b8   : > { %v750_v24 = vpop.permute.xlu1 %749  ;;  %v801_v11 = vmul.u32 %v3185_v2, %v752_v57  ;;  %v807_v53 = vsub.s32 1, %v752_v57  ;;  %v768_v52 = vadd.s32 %v765_v25, %v752_v57  ;;  %v573_v25 = vadd.s32 %v570_v36, %v2212_v29 }
 0x1b9   : > { %v800_v40 = vmul.u32 %v3180_v56, %v750_v24  ;;  %v806_v48 = vsub.s32 1, %v750_v24  ;;  %v607_v56 = vadd.s32 %v604_v45, %v598_v60  ;;  %v767_v51 = vadd.s32 %v764_v16, %v750_v24 }
 0x1ba   : > { %v3196_v8 = vmov 0  ;;  %v810_v45 = vmul.u32 %v807_v53, %v2231_v32  ;;  %v3201_v43 = vsub.s32 1, %v2277_v50  ;;  %v3208_v54 = vsub.s32 1, %v2203_v3 }
 0x1bb   : > { %v558_v37 = vpop.permute.xlu0 %557  ;;  %v803_v60 = vadd.s32 %v800_v40, %v794_v55  ;;  %v809_v16 = vmul.u32 %v806_v48, %v2227_v0  ;;  %v3197_v8 = vsel %vm2464_vm5, 4294967295, %v3196_v8  ;;  %v804_v55 = vadd.s32 %v801_v11, %v795_v31 }
 0x1bc   : > { %v754_v2 = vpop.permute.xlu1 %753  ;;  %v620_v47 = vmul.u32 %v3208_v54, %v558_v37  ;;  %v626_v23 = vsub.s32 1, %v558_v37  ;;  %v615_v36 = vadd.s32 %v612_v44, %v606_v39  ;;  %v616_v38 = vadd.s32 %v613_v26, %v607_v56 }
 0x1bd   : > { %v802_v24 = vmul.u32 %v3201_v43, %v754_v2  ;;  %v808_v57 = vsub.s32 1, %v754_v2  ;;  %v3209_v48 = vmov 0  ;;  %v3214_v3 = vsub.s32 1, %v2212_v29 }
 0x1be   : > { %v3210_v48 = vsel %vm2500_vm7, 4294967295, %v3209_v48  ;;  %v770_v11 = vadd.s32 %v767_v51, %v2227_v0  ;;  %v771_v53 = vadd.s32 %v768_v52, %v2231_v32  ;;  %v769_v39 = vadd.s32 %v766_v49, %v754_v2  ;;  %vm2548_vm7 = vmand %vm2415_vm9, %vm3223_vm3 }
 0x1bf   : > { %v562_v40 = vpop.permute.xlu0 %561  ;;  %v575_v44 = vadd.s32 %v572_v46, %v558_v37  ;;  %v3217_v29 = vsub.s32 1, %v2216_v28  ;;  %v805_v41 = vadd.s32 %v802_v24, %v796_v35  ;;  %v811_v51 = vmul.u32 %v808_v57, %v2239_v6  ;;  %vm2564_vm9 = vmand %vm853_vm12, %vm3228_vm6 }
 0x1c0   : > { %v560_v59 = vpop.permute.xlu1 %559  ;;  %v628_v34 = vsub.s32 1, %v562_v40  ;;  %v812_v43 = vadd.s32 %v809_v16, %v803_v60  ;;  %v813_v54 = vadd.s32 %v810_v45, %v804_v55  ;;  %v623_v49 = vadd.s32 %v620_v47, %v614_v13  ;;  %vm2575_vm3 = vmand %vm2438_vm4, %vm3232_vm10  ;;  %v3303_v16 = vld [vmem:[#allocation26_spill] sm:$0xff] }
 0x1c1   : > { %v621_v14 = vmul.u32 %v3214_v3, %v560_v59  ;;  %v627_v26 = vsub.s32 1, %v560_v59  ;;  %v622_v56 = vmul.u32 %v3217_v29, %v562_v40  ;;  %v576_v2 = vadd.s32 %v573_v25, %v560_v59  ;;  %vm2586_vm12 = vmxor %vm2548_vm7, %vm3190_vm2 }
 0x1c2   : > { %v629_v46 = vmul.u32 %v626_v23, %v2279_v62  ;;  %v577_v35 = vadd.s32 %v574_v5, %v562_v40  ;;  %v3231_v5 = vsub.s32 1, %v2227_v0  ;;  %v631_v31 = vmul.u32 %v628_v34, %v2283_v61  ;;  %vm3238_vm6 = vmmov %vm3232_vm10 }
 0x1c3   : > { %v758_v60 = vpop.permute.xlu0 %757  ;;  %v624_v13 = vadd.s32 %v621_v14, %v615_v36  ;;  %v630_v25 = vmul.u32 %v627_v26, %v2281_v58  ;;  %v625_v57 = vadd.s32 %v622_v56, %v616_v38  ;;  %v2581_v23 = vadd.s32 %v769_v39, %v2239_v6  ;;  %vm2600_vm10 = vmand %vm2472_vm14, %vm3238_vm6 }
 0x1c4   : > { %v756_v50 = vpop.permute.xlu1 %755  ;;  %v3237_v12 = vsub.s32 1, %v2231_v32  ;;  %v825_v59 = vsub.s32 1, %v758_v60  ;;  %v2592_v40 = vadd.s32 %v811_v51, %v805_v41  ;;  %v578_v38 = vadd.s32 %v575_v44, %v2279_v62  ;;  %vm2617_vm14 = vmxor %vm2575_vm3, %vm3190_vm2 }
 0x1c5   : > { %v818_v55 = vmul.u32 %v3231_v5, %v756_v50  ;;  %v824_v45 = vsub.s32 1, %v756_v50  ;;  %v773_v47 = vadd.s32 %v770_v11, %v756_v50  ;;  %v2604_v14 = vadd.s32 %v771_v53, %v758_v60 }
 0x1c6   : > { %v819_v36 = vmul.u32 %v3237_v12, %v758_v60  ;;  %v632_v32 = vadd.s32 %v629_v46, %v623_v49  ;;  %v579_v10 = vadd.s32 %v576_v2, %v2281_v58  ;;  %v580_v39 = vadd.s32 %v577_v35, %v2283_v61  ;;  %v3318_v12 = vld [vmem:[#allocation21_spill] sm:$0xff] (%p107_p2) }
 0x1c7   : > { %v546_v11 = vpop.permute.xlu0 %545  ;;  %v3241_v20 = vmov 0  ;;  %vm3243_vm6 = vcmp.gt.s32.totalorder %v2287_v7, 0  ;;  %v821_v44 = vadd.s32 %v818_v55, %v812_v43  ;;  %v827_v29 = vmul.u32 %v824_v45, %v2285_v15 }
 0x1c8   : > { %v2606_v26 = vpop.permute.xlu1 %759  ;;  %v3242_v20 = vsel %vm2617_vm14, 4294967295, %v3241_v20  ;;  %vm2625_vm4 = vmand %vm2483_vm8, %vm3243_vm6  ;;  %v581_v56 = vadd.s32 %v578_v38, %v546_v11  ;;  %v633_v34 = vadd.s32 %v630_v25, %v624_v13  ;;  %v3249_v51 = vsub.s32 1, %v2279_v62 }
 0x1c9   : > { %vm3246_vm7 = vmmov %vm3243_vm6  ;;  %v644_v28 = vsub.s32 1, %v546_v11  ;;  %v634_v49 = vadd.s32 %v631_v31, %v625_v57  ;;  %v776_v46 = vadd.s32 %v773_v47, %v2285_v15  ;;  %v3250_v43 = vmov 0 }
 0x1ca   : > { %vm2634_vm3 = vmand %vm2508_vm0, %vm3246_vm7  ;;  %v638_v9 = vmul.u32 %v3249_v51, %v546_v11  ;;  %v822_v2 = vadd.s32 %v819_v36, %v813_v54  ;;  %v828_v4 = vmul.u32 %v825_v59, %v2287_v7  ;;  %v3252_v35 = vsub.s32 1, %v2239_v6 }
 0x1cb   : > { %vm2644_vm8 = vmxor %vm2600_vm10, %vm3190_vm2  ;;  %vm668_vm0 = vcmp.ge.s32.totalorder %v581_v56, 2  ;;  %vm3253_vm7 = vnez %v3210_v48  ;;  %v826_v62 = vsub.s32 1, %v2606_v26  ;;  %v647_v13 = vmul.u32 %v644_v28, %v2161_v21  ;;  %v550_v25 = vpop.permute.xlu0 %549 }
 0x1cc   : > { %v3251_v43 = vsel %vm2644_vm8, 4294967295, %v3250_v43  ;;  %v820_v50 = vmul.u32 %v3252_v35, %v2606_v26  ;;  %v641_v60 = vadd.s32 %v638_v9, %v632_v32  ;;  %vm3254_vm10 = vcmp.gt.s32.totalorder %v2067_v30, 0  ;;  %v548_v6 = vpop.permute.xlu1 %547  ;;  %vm2667_vm5 = vmxor %vm2625_vm4, %vm3190_vm2 }
 0x1cd   : > { %vm2660_vm14 = vmand %vm3254_vm10, %vm668_vm0  ;;  %v3257_v5 = vmov 0  ;;  %v3259_v21 = vmov 0  ;;  %vm3261_vm0 = vcmp.gt.s32.totalorder %v2289_v17, 0  ;;  %v582_v45 = vadd.s32 %v579_v10, %v548_v6 }
 0x1ce   : > { %v3258_v5 = vsel %vm2667_vm5, 4294967295, %v3257_v5  ;;  %vm2674_vm6 = vmxor %vm2634_vm3, %vm3190_vm2  ;;  %v3264_v24 = vsub.s32 1, %v2281_v58  ;;  %v645_v31 = vsub.s32 1, %v548_v6  ;;  %v830_v47 = vadd.s32 %v827_v29, %v821_v44 }
 0x1cf   : > { %v3260_v21 = vsel %vm2674_vm6, 4294967295, %v3259_v21  ;;  %vm2682_vm10 = vmand %vm2540_vm11, %vm3261_vm0  ;;  %v650_v37 = vadd.s32 %v647_v13, %v641_v60  ;;  %v583_v36 = vadd.s32 %v580_v39, %v550_v25  ;;  %v3268_v59 = vsub.s32 1, %v2283_v61  ;;  %v3275_v39 = vld [vmem:[#allocation27_spill] sm:$0xff] }
 0x1d0   : > { %v639_v57 = vmul.u32 %v3264_v24, %v548_v6  ;;  %vm3265_vm3 = vmmov %vm3261_vm0  ;;  %v646_v3 = vsub.s32 1, %v550_v25  ;;  %vm3269_vm11 = vcmp.le.s32.totalorder %v581_v56, 6  ;;  %v648_v22 = vmul.u32 %v645_v31, %v2170_v63  ;;  %v744_v44 = vpop.permute.xlu1 %743  ;;  %v746_v63 = vpop.permute.xlu0 %745  ;;  %v3317_v31 = vld [vmem:[#allocation20_spill] sm:$0xff] (%p107_p2) }
 0x1d1   : > { %vm2693_vm8 = vmand %vm2564_vm9, %vm3265_vm3  ;;  %v640_v38 = vmul.u32 %v3268_v59, %v550_v25  ;;  %vm669_vm9 = vcmp.ge.s32.totalorder %v582_v45, 2  ;;  %v831_v11 = vadd.s32 %v828_v4, %v822_v2  ;;  %vm680_vm4 = vcmp.eq.s32.totalorder %v650_v37, 1  ;;  %v3322_v59 = vld [vmem:[#allocation23_spill] sm:$0xff] (%p107_p2) }
 0x1d2   : > { %vm2702_vm0 = vmand %vm2660_vm14, %vm3269_vm11  ;;  %v642_v32 = vadd.s32 %v639_v57, %v633_v34  ;;  %vm3272_vm5 = vcmp.gt.s32.totalorder %v2089_v42, 0  ;;  %vm675_vm14 = vcmp.le.s32.totalorder %v582_v45, 6  ;;  %v649_v53 = vmul.u32 %v646_v3, %v3275_v39 }
 0x1d3   : > { %vm2713_vm6 = vmand %vm3272_vm5, %vm669_vm9  ;;  %v643_v10 = vadd.s32 %v640_v38, %v634_v49  ;;  %v3276_v29 = vmov 0  ;;  %v3278_v56 = vmov 0  ;;  %v823_v34 = vadd.s32 %v820_v50, %v2592_v40 }
 0x1d4   : > { %vm2721_vm11 = vmxor %vm2682_vm10, %vm3190_vm2  ;;  %v829_v41 = vmul.u32 %v826_v62, %v2289_v17  ;;  %v651_v51 = vadd.s32 %v648_v22, %v642_v32  ;;  %v3280_v9 = vsub.s32 1, %v2285_v15  ;;  %vm3281_vm10 = vnez %v3197_v8  ;;  %v748_v62 = vpop.permute.xlu1 %747 }
 0x1d5   : > { %v3277_v29 = vsel %vm2721_vm11, 4294967295, %v3276_v29  ;;  %vm2728_vm5 = vmxor %vm2693_vm8, %vm3190_vm2  ;;  %v652_v49 = vadd.s32 %v649_v53, %v643_v10  ;;  %vm670_vm8 = vcmp.ge.s32.totalorder %v583_v36, 2  ;;  %v842_v2 = vsub.s32 1, %v744_v44 }
 0x1d6   : > { %v3279_v56 = vsel %vm2728_vm5, 4294967295, %v3278_v56  ;;  %vm683_vm9 = vmand %vm2702_vm0, %vm680_vm4  ;;  %v836_v28 = vmul.u32 %v3280_v9, %v744_v44  ;;  %v3283_v40 = vsub.s32 1, %v2287_v7  ;;  %vm681_vm0 = vcmp.eq.s32.totalorder %v651_v51, 1 }
 0x1d7   : > { %vm3282_vm3 = vmand %vm2445_vm13, %vm3281_vm10  ;;  %v779_v15 = vadd.s32 %v776_v46, %v744_v44  ;;  %v775_v8 = vadd.s32 %v2581_v23, %v2606_v26  ;;  %vm676_vm10 = vcmp.le.s32.totalorder %v583_v36, 6  ;;  %v835_v50 = vsub.s32 1, %v2289_v17 }
 0x1d8   : > { %vm707_vm2 = vmand %vm683_vm9, %vm3282_vm3  ;;  %v837_v4 = vmul.u32 %v3283_v40, %v746_v63  ;;  %v839_v33 = vadd.s32 %v836_v28, %v830_v47  ;;  %v777_v46 = vadd.s32 %v2604_v14, %v2287_v7  ;;  %v843_v13 = vsub.s32 1, %v746_v63  ;;  %v3290_v7 = vld [vmem:[#allocation25_spill] sm:$0xff] }
 0x1d9   : > { %v2746_v22 = vsel %vm707_vm2, 0, %v2067_v30   ;;  %vm678_vm4 = vmand %vm2713_vm6, %vm675_vm14  ;;  %v845_v30 = vmul.u32 %v842_v2, %v2185_v19  ;;  %vm682_vm2 = vcmp.eq.s32.totalorder %v652_v49, 1  ;;  %v838_v26 = vmul.u32 %v835_v50, %v748_v62  ;;  %v3333_v28 = vld [vmem:[#allocation13_spill] sm:$0xff] (%p107_p2)  ;;  %v3334_v2 = vld [vmem:[#allocation16_spill] sm:$0xff] (%p107_p2) }
 0x1da   : > { %v3284_v35 = vmov %v2746_v22  ;;  %vm684_vm9 = vmand %vm678_vm4, %vm681_vm0  ;;  %v840_v60 = vadd.s32 %v837_v4, %v831_v11  ;;  %vm3289_vm4 = vcmp.gt.s32.totalorder %v2107_v27, 0  ;;  %v844_v48 = vsub.s32 1, %v748_v62 }
 0x1db   : > { %vm3287_vm6 = vmand %vm3253_vm7, %vm2530_vm15  ;;  %v848_v19 = vadd.s32 %v845_v30, %v839_v33  ;;  %vm866_vm11 = vcmp.ge.s32.totalorder %v779_v15, 2  ;;  %v780_v52 = vadd.s32 %v777_v46, %v746_v63  ;;  %v846_v54 = vmul.u32 %v843_v13, %v2189_v18 }
 0x1dc   : > { %vm708_vm14 = vmand %vm684_vm9, %vm3287_vm6  ;;  %v832_v6 = vadd.s32 %v829_v41, %v823_v34  ;;  %vm863_vm7 = vcmp.gt.s32.totalorder %v3290_v7, 0  ;;  %vm872_vm9 = vcmp.le.s32.totalorder %v779_v15, 6  ;;  %v847_v25 = vmul.u32 %v844_v48, %v2199_v1  ;;  %v3331_v41 = vld [vmem:[#allocation15_spill] sm:$0xff] (%p107_p2)  ;;  %v3336_v15 = vld [vmem:[#allocation14_spill] sm:$0xff] (%p107_p2) }
 0x1dd   : > { %v2767_v24 = vsel %vm708_vm14, 0, %v2089_v42   ;;  %vm673_vm0 = vmand %vm3289_vm4, %vm670_vm8  ;;  %v778_v42 = vadd.s32 %v775_v8, %v2289_v17  ;;  %vm878_vm4 = vcmp.eq.s32.totalorder %v848_v19, 1  ;;  %v849_v18 = vadd.s32 %v846_v54, %v840_v60  ;;  %v3337_v8 = vld [vmem:[#allocation17_spill] sm:$0xff] (%p107_p2) }
 0x1de   : > { %v3288_v23 = vmov %v2767_v24  ;;  %vm679_vm3 = vmand %vm673_vm0, %vm676_vm10  ;;  %v841_v14 = vadd.s32 %v838_v26, %v832_v6  ;;  %vm867_vm0 = vcmp.ge.s32.totalorder %v780_v52, 2  ;;  %vm873_vm6 = vcmp.le.s32.totalorder %v780_v52, 6 }
 0x1df   : > { %vm685_vm15 = vmand %vm679_vm3, %vm682_vm2  ;;  %v781_v45 = vadd.s32 %v778_v42, %v748_v62  ;;  %vm3301_vm5 = vnez %v3260_v21  ;;  %v3313_v24 = vmov %v3288_v23  ;;  %v3314_v22 = vmov %v3284_v35 }
 0x1e0   : > { %vm3293_vm8 = vmand %vm2556_vm1, %vm2586_vm12  ;;  %v850_v1 = vadd.s32 %v847_v25, %v841_v14  ;;  %vm3300_vm12 = vnez %v3258_v5  ;;  %v3316_v5 = vld [vmem:[#allocation19_spill] sm:$0xff] (%p107_p2)  ;;  %v943_v47 = vsub.f32 (%p107_p2), 1.0, %v3317_v31  ;;  %v957_v49 = vsub.f32 (%p107_p2), 1.0, %v3333_v28 }
 0x1e1   : > { %vm709_vm10 = vmand %vm685_vm15, %vm3293_vm8  ;;  %vm3295_vm15 = vnez %v3242_v20  ;;  %vm3296_vm8 = vnez %v3251_v43  ;;  %vm874_vm1 = vcmp.le.s32.totalorder %v781_v45, 6  ;;  %v3315_v43 = vld [vmem:[#allocation18_spill] sm:$0xff] (%p107_p2)  ;;  %v942_v57 = vsub.f32 (%p107_p2), 1.0, %v3316_v5 }
 0x1e2   : > { %v2786_v55 = vsel %vm709_vm10, 0, %v2107_v27   ;;  %vm869_vm3 = vmand %vm863_vm7, %vm866_vm11  ;;  %v3298_v27 = vld [vmem:[#allocation24_spill] sm:$0xff]  ;;  %vm879_vm11 = vcmp.eq.s32.totalorder %v849_v18, 1  ;;  %1102 = vlog2.f32 (%p107_p2), %v3315_v43  ;;  %v941_v21 = vsub.f32 (%p107_p2), 1.0, %v3315_v43 }
 0x1e3   : > { %vm875_vm2 = vmand %vm869_vm3, %vm872_vm9  ;;  %vm864_vm7 = vcmp.gt.s32.totalorder %v3298_v27, 0  ;;  %vm868_vm3 = vcmp.ge.s32.totalorder %v781_v45, 2  ;;  %v3312_v25 = vmov %v2786_v55  ;;  %1104 = vlog2.f32 (%p107_p2), %v3316_v5 }
 0x1e4   : > { %vm881_vm13 = vmand %vm875_vm2, %vm878_vm4  ;;  %1106 = vlog2.f32 (%p107_p2), %v3317_v31  ;;  %v958_v33 = vsub.f32 (%p107_p2), 1.0, %v3336_v15 }
 0x1e5   : > { %vm3297_vm14 = vmand %vm3295_vm15, %vm3296_vm8  ;;  %1108 = vlog2.f32 (%p107_p2), %v941_v21 }
 0x1e6   : > { %vm905_vm10 = vmand %vm881_vm13, %vm3297_vm14  ;;  %vm865_vm13 = vcmp.gt.s32.totalorder %v3303_v16, 0  ;;  %vm880_vm14 = vcmp.eq.s32.totalorder %v850_v1, 1  ;;  %1110 = vlog2.f32 (%p107_p2), %v942_v57 }
 0x1e7   : > { %v2800_v37 = vsel %vm905_vm10, 0, %v3290_v7   ;;  %vm870_vm9 = vmand %vm864_vm7, %vm867_vm0  ;;  %1112 = vlog2.f32 (%p107_p2), %v943_v47 }
 0x1e8   : > { %v3299_v17 = vmov %v2800_v37  ;;  %vm876_vm4 = vmand %vm870_vm9, %vm873_vm6  ;;  %vm3305_vm6 = vnez %v3277_v29  ;;  %v3330_v29 = vld [vmem:[#allocation12_spill] sm:$0xff] (%p107_p2) }
 0x1e9   : > { %vm882_vm2 = vmand %vm876_vm4, %vm879_vm11  ;;  %vm3306_vm11 = vnez %v3279_v56  ;;  %v3311_v37 = vmov %v3299_v17  ;;  %v956_v56 = vsub.f32 (%p107_p2), 1.0, %v3330_v29 }
 0x1ea   : > { %vm3302_vm8 = vmand %vm3300_vm12, %vm3301_vm5  ;;  %vm911_vm5 = vcmp.gt.s32.totalorder (%p107_p2), %v3284_v35, 0  ;;  %vm3319_vm12 = vnez (%p107_p2), %v3318_v12  ;;  %v3320_v37 = vld [vmem:[#allocation22_spill] sm:$0xff] (%p107_p2) }
 0x1eb   : > { %vm906_vm15 = vmand %vm882_vm2, %vm3302_vm8  ;;  %vm912_vm2 = vcmp.gt.s32.totalorder (%p107_p2), %v3288_v23, 0  ;;  %vm3321_vm8 = vnez (%p107_p2), %v3320_v37 }
 0x1ec   : > { %v2809_v39 = vsel %vm906_vm15, 0, %v3298_v27   ;;  %vm871_vm10 = vmand %vm865_vm13, %vm868_vm3  ;;  %v1103_v24 = vpop.eup (%p107_p2), %1102  ;;  %vm913_vm13 = vcmp.gt.s32.totalorder (%p107_p2), %v2786_v55, 0 }
 0x1ed   : > { %v3304_v0 = vmov %v2809_v39  ;;  %vm877_vm0 = vmand %vm871_vm10, %vm874_vm1  ;;  %109 = sbr.rel (!%p107_p2) target bundleno = 75 (0x4b), region = 44  ;;  %vm1238_vm1 = vmmov (%p107_p2), 1   ;;  %v1105_v36 = vpop.eup (%p107_p2), %1104  ;;  %v933_v38 = vmul.f32 (%p107_p2), 0.6931472, %v1103_v24 }
 0x1ee   : > { %vm883_vm7 = vmand %vm877_vm0, %vm880_vm14  ;;  %v3310_v39 = vmov %v3304_v0  ;;  %vm3323_vm14 = vnez (%p107_p2), %v3322_v59  ;;  %v1107_v3 = vpop.eup (%p107_p2), %1106  ;;  %v935_v32 = vmul.f32 (%p107_p2), 0.6931472, %v1105_v36 }
 0x1ef   : > { %vm3307_vm9 = vmand %vm3305_vm6, %vm3306_vm11  ;;  %v1109_v22 = vpop.eup (%p107_p2), %1108  ;;  %v937_v61 = vmul.f32 (%p107_p2), 0.6931472, %v1107_v3  ;;  %v938_v10 = vmax.f32 (%p107_p2), %v933_v38, -100.0  ;;  %vm914_vm6 = vcmp.gt.s32.totalorder (%p107_p2), %v3299_v17, 0 }
 0x1f0   : > { %vm907_vm4 = vmand %vm883_vm7, %vm3307_vm9  ;;  %v1111_v39 = vpop.eup (%p107_p2), %1110  ;;  %v939_v44 = vmax.f32 (%p107_p2), %v935_v32, -100.0  ;;  %v945_v63 = vmul.f32 (%p107_p2), 0.6931472, %v1109_v22  ;;  %vm915_vm9 = vcmp.gt.s32.totalorder (%p107_p2), %v3304_v0, 0 }
 0x1f1   : > { %v2817_v40 = vsel %vm907_vm4, 0, %v3303_v16   ;;  %vm917_vm3 = vmxor (%p107_p2), %vm3319_vm12, %vm1238_vm1  ;;  %v1113_v34 = vpop.eup (%p107_p2), %1112  ;;  %vm3332_vm4 = vnez (%p107_p2), %v3331_v41  ;;  %v940_v51 = vmax.f32 (%p107_p2), %v937_v61, -100.0  ;;  %v947_v9 = vmul.f32 (%p107_p2), 0.6931472, %v1111_v39 }
 0x1f2   : > { %v3308_v20 = vmov %v2817_v40  ;;  %vm918_vm15 = vmxor (%p107_p2), %vm3321_vm8, %vm1238_vm1  ;;  %vm3335_vm12 = vnez (%p107_p2), %v3334_v2  ;;  %v950_v4 = vmax.f32 (%p107_p2), %v945_v63, -100.0  ;;  %v953_v35 = vmul.f32 (%p107_p2), %v938_v10, %v3330_v29 }
 0x1f3   : > { %v3309_v40 = vmov %v3308_v20  ;;  %vm919_vm10 = vmxor (%p107_p2), %vm3323_vm14, %vm1238_vm1  ;;  %vm3338_vm8 = vnez (%p107_p2), %v3337_v8  ;;  %v951_v30 = vmax.f32 (%p107_p2), %v947_v9, -100.0  ;;  %v954_v50 = vmul.f32 (%p107_p2), %v939_v44, %v3333_v28 }
 0x1f4   :  { %vm2858_vm0 = vmand %vm911_vm5, %vm917_vm3  ;;  %v949_v40 = vmul.f32 0.6931472, %v1113_v34  ;;  %v955_v60 = vmul.f32 %v940_v51, %v3336_v15  ;;  %v959_v13 = vmul.f32 %v956_v56, %v950_v4 }
 0x1f5   :  { %vm2862_vm7 = vmand %vm912_vm2, %vm918_vm15  ;;  %vm916_vm2 = vcmp.gt.s32.totalorder %v3308_v20, 0  ;;  %v960_v23 = vmul.f32 %v957_v49, %v951_v30 }
 0x1f6   :  { %vm2867_vm11 = vmand %vm913_vm13, %vm919_vm10  ;;  %v952_v46 = vmax.f32 %v949_v40, -100.0  ;;  %v962_v26 = vadd.f32 %v959_v13, %v953_v35 }
 0x1f7   :  { %vm923_vm5 = vmxor %vm3332_vm4, %vm1238_vm1  ;;  %v963_v48 = vadd.f32 %v960_v23, %v954_v50 }
 0x1f8   :  { %vm924_vm3 = vmxor %vm3335_vm12, %vm1238_vm1  ;;  %v961_v19 = vmul.f32 %v958_v33, %v952_v46  ;;  %v965_v54 = vsub.f32 0.0, %v962_v26 }
 0x1f9   :  { %vm925_vm15 = vmxor %vm3338_vm8, %vm1238_vm1  ;;  %v966_v6 = vsub.f32 0.0, %v963_v48 }
 0x1fa   :  { %vm2889_vm13 = vmand %vm914_vm6, %vm923_vm5  ;;  %v964_v52 = vadd.f32 %v961_v19, %v955_v60 }
 0x1fb   :  { %vm927_vm14 = vmand %vm915_vm9, %vm924_vm3 }
 0x1fc   :  { %vm928_vm10 = vmand %vm916_vm2, %vm925_vm15  ;;  %v967_v7 = vsub.f32 0.0, %v964_v52 }
 0x1fd   :  { %vm929_vm1 = vmor %vm2858_vm0, %vm2889_vm13 }
 0x1fe   :  { %vm930_vm6 = vmor %vm2862_vm7, %vm927_vm14  ;;  %v968_v42 = vsel %vm929_vm1, %v965_v54, 0.0 }
 0x1ff   :  { %vm931_vm4 = vmor %vm2867_vm11, %vm928_vm10  ;;  %v969_v18 = vsel %vm930_vm6, %v966_v6, 0.0 }
 0x200   :  { %v970_v14 = vsel %vm931_vm4, %v967_v7, 0.0  ;;  %v971_v25 = vadd.f32 %v969_v18, %v968_v42 }
 0x202   :  { %v972_v55 = vadd.f32 %v971_v25, %v970_v14 }
 0x204   :  { %973 = vadd.xlane.f32.xlu0 %v972_v55 }
 0x291   :  { %v974_v45 = vpop.xlane.xlu0 %973 }
 0x292   :  { %v975_v27 = vrot.slane %v974_v45, 4 }
 0x294   :  { %v976_v1 = vadd.f32 %v975_v27, %v974_v45 }
 0x296   :  { %v977_v17 = vrot.slane %v976_v1, 2 }
 0x298   :  { %v978_v16 = vadd.f32 %v977_v17, %v976_v1 }
 0x29a   :  { %v979_v0 = vrot.slane %v978_v16, 1 }
 0x29c   :  { %v980_v20 = vadd.f32 %v979_v0, %v978_v16 }
 0x29e   :  { %1022 = vpush %v980_v20 }
 0x2cf   :  { %s1023_s8 = spop %1022 }
 0x2d0   :  { %983 = sst [smem:[#allocation7]] %s1023_s8 }
 0x2d1   :  { %1167 = shalt.err (!%p1164_p5)
}
 0x2d2   :  { %s1239_s16 = smov [#allocation7]  }
 0x2d3   :  { %991 = dma.smem_to_hbm %s1239_s16, 16, %s2918_s2, [#allocation4]  }
 0x2d4   :  { %1200 = dma.done.wait [#allocation4], 16  }
 0x2d5   :  { %1201 = vsyncadd [#allocation4], 4294967280 }
 0x2d6   :  { %995 = sfence }
 0x2d7   :  { %996 = vsyncpa [#allocation3], 1 }
 0x2d8   :  { %997 = vsyncpa [#allocation6], 1 }
 0x2d9   :  { %998 = vsyncpa [#allocation4], 1 }

</bundles_post_ra>
